<compile_context>
chip_gen: v7x
topology: tpu7x:2x2x1
jax: 0.10.0
libtpu: 0.0.40
codegen_flags: <defaults>
</compile_context>

<pallas_src>
import jax
import jax.numpy as jnp
from jax.experimental import pallas as pl
from jax.experimental.pallas import tpu as pltpu


HO = WO = 8            # res-block spatial size (16 / stride 2)
M1 = HO * WO           # 64 output positions per sample
C0, C1 = 32, 64        # conv0 / res-block channel counts


# ----------------------------------------------------------------------------
# Fused kernel: conv0 -> conv1(+BN1,ReLU) | shortcut -> conv2(+BN2)+res -> pool+fc
# ----------------------------------------------------------------------------
def resnet_fused_kernel(p0_ref, w0_ref, b0_ref,
                        w1_ref, b1_ref, wsc_ref, bsc_ref,
                        w2_ref, b2_ref, fcw_ref, fcb_ref,
                        out_ref, p1_ref, p2_ref):
    f32, bf16 = jnp.float32, jnp.bfloat16

    # ---- conv0: 1 -> 32, 3x3, pad 1, stride 1 (+bias, ReLU) -----------------
    # p0 rows are phase-major: slab p = 2*er + ec holds output positions
    # (2*i + er, 2*j + ec), i,j in [0,8), 8x8 row-major inside the slab.
    y0 = jnp.dot(p0_ref[0], w0_ref[...], preferred_element_type=f32)
    y0 = jnp.maximum(y0 + b0_ref[...], 0.0)                     # (4*M1, 32) f32

    # Row-index iotas over the flattened 8x8 output map (for pad masking).
    r1 = jax.lax.broadcasted_iota(jnp.int32, (M1, C0), 0)
    r2 = jax.lax.broadcasted_iota(jnp.int32, (M1, C1), 0)

    # ---- conv1 taps (3x3, stride 2, pad 1): slab slice + roll + mask --------
    # tap (di, dj) reads y0 at (2*oh + di - 1, 2*ow + dj - 1):
    #   row phase er = (di-1)&1, col phase ec = (dj-1)&1,
    #   row shift -1 iff di == 0, col shift -1 iff dj == 0.
    for di in range(3):
        for dj in range(3):
            k = di * 3 + dj
            er = (1, 0, 1)[di]
            ec = (1, 0, 1)[dj]
            slab = y0[(2 * er + ec) * M1:(2 * er + ec + 1) * M1, :]
            shift = (WO if di == 0 else 0) + (1 if dj == 0 else 0)
            g = pltpu.roll(slab, shift=shift, axis=0) if shift else slab
            valid = None
            if di == 0:                                   # oh == 0 -> row -1
                valid = r1 >= WO
            if dj == 0:                                   # ow == 0 -> col -1
                c = jnp.bitwise_and(r1, WO - 1) != 0
                valid = c if valid is None else jnp.logical_and(valid, c)
            if valid is not None:
                g = jnp.where(valid, g, jnp.zeros_like(g))
            p1_ref[:, k * C0:(k + 1) * C0] = g.astype(bf16)

    # One K=288 matmul (BN1 folded into w1/b1), then ReLU.
    c1 = jnp.dot(p1_ref[...], w1_ref[...], preferred_element_type=f32)
    c1 = jnp.maximum(c1 + b1_ref[...], 0.0)                     # (64, 64) f32

    # ---- 1x1 stride-2 shortcut == phase (even,even) slab of y0 --------------
    sc = jnp.dot(y0[0:M1, :].astype(bf16), wsc_ref[...],
                 preferred_element_type=f32) + bsc_ref[...]     # (64, 64) f32

    # ---- conv2 taps (3x3, stride 1, pad 1) on the 8x8 map -------------------
    for di in range(3):
        for dj in range(3):
            k = di * 3 + dj
            off = (di - 1) * WO + (dj - 1)                # g[r] = c1[r + off]
            g = pltpu.roll(c1, shift=(-off) % M1, axis=0) if off else c1
            conds = []
            if di == 0:
                conds.append(r2 >= WO)                    # oh == 0
            if di == 2:
                conds.append(r2 < M1 - WO)                # oh == 7
            if dj == 0:
                conds.append(jnp.bitwise_and(r2, WO - 1) != 0)       # ow == 0
            if dj == 2:
                conds.append(jnp.bitwise_and(r2, WO - 1) != WO - 1)  # ow == 7
            if conds:
                valid = conds[0]
                for c in conds[1:]:
                    valid = jnp.logical_and(valid, c)
                g = jnp.where(valid, g, jnp.zeros_like(g))
            p2_ref[:, k * C1:(k + 1) * C1] = g.astype(bf16)

    # One K=576 matmul (BN2 folded) + residual + ReLU.
    a2 = jnp.dot(p2_ref[...], w2_ref[...], preferred_element_type=f32)
    a2 = jnp.maximum(a2 + b2_ref[...] + sc, 0.0)                # (64, 64) f32

    # ---- global average pool + fc (mean commutes with the linear fc) --------
    t = jnp.dot(a2.astype(bf16), fcw_ref[...], preferred_element_type=f32)  # (64, 10)
    logits = jnp.sum(t, axis=0, keepdims=True) * (1.0 / M1) + fcb_ref[...]
    out_ref[0] = logits.astype(out_ref.dtype)


# ----------------------------------------------------------------------------
# Wrapper-side packing: BN folding, tap-major weight layout, phase-major patches
# ----------------------------------------------------------------------------
def fold_bn(conv_bias, bn, eps=1e-5):
    # BN(conv(x) + b) == conv_nobias(x) * scale + shift   (eval-mode stats)
    gamma, beta, mean, var = bn
    scale = gamma / jnp.sqrt(var + eps)
    shift = (conv_bias - mean) * scale + beta
    return scale, shift


def conv0_patches_phase_major(x_nchw):
    """(n,1,H,W) -> (n, H*W, 9) bf16 3x3/pad-1 patches; rows phase-major:
    slab p = 2*er + ec holds positions (2i+er, 2j+ec), 8x8 row-major."""
    n, _, h, w = x_nchw.shape
    x = jnp.transpose(x_nchw, (0, 2, 3, 1)).astype(jnp.float32)     # NHWC, C=1
    xp = jnp.pad(x, ((0, 0), (1, 1), (1, 1), (0, 0)))
    cols = [xp[:, di:di + h, dj:dj + w, 0] for di in range(3) for dj in range(3)]
    p = jnp.stack(cols, axis=-1)                                    # (n,h,w,9)
    p = p.reshape(n, h // 2, 2, w // 2, 2, 9)
    p = jnp.transpose(p, (0, 2, 4, 1, 3, 5))                        # (n,er,ec,i,j,9)
    return p.reshape(n, h * w, 9).astype(jnp.bfloat16)


def pack_model(params):
    bf16, f32 = jnp.bfloat16, jnp.float32

    # conv0 (no BN): (32,1,3,3) -> (9, 32), row k = 3*di + dj.
    w0 = jnp.transpose(params["conv0_w"], (2, 3, 1, 0)).reshape(9, C0)
    b0 = params["conv0_b"].reshape(1, C0)

    # conv1 + BN1 folded; tap-major / channel-minor rows -> (288, 64).
    sc1, sh1 = fold_bn(params["conv1_b"], params["bn1"])
    w1 = (jnp.transpose(params["conv1_w"], (2, 3, 1, 0)).reshape(9, C0, C1) * sc1)
    w1 = w1.reshape(9 * C0, C1)

    # 1x1 stride-2 shortcut + BN folded -> (32, 64).
    scs, shs = fold_bn(params["sc_b"], params["bn_sc"])
    wsc = params["sc_w"][:, :, 0, 0].T * scs

    # conv2 + BN2 folded -> (576, 64).
    sc2, sh2 = fold_bn(params["conv2_b"], params["bn2"])
    w2 = (jnp.transpose(params["conv2_w"], (2, 3, 1, 0)).reshape(9, C1, C1) * sc2)
    w2 = w2.reshape(9 * C1, C1)

    return (w0.astype(bf16), b0.astype(f32),
            w1.astype(bf16), sh1.reshape(1, C1).astype(f32),
            wsc.astype(bf16), shs.reshape(1, C1).astype(f32),
            w2.astype(bf16), sh2.reshape(1, C1).astype(f32),
            params["fc_w"].astype(bf16), params["fc_b"].reshape(1, 10).astype(f32))


# ----------------------------------------------------------------------------
# Forward pass: one pallas_call, grid over batch, weights VMEM-resident
# ----------------------------------------------------------------------------
def resnet_like_forward(x_nchw, packed):
    n, _, h, w = x_nchw.shape
    assert h == 2 * HO and w == 2 * WO, "demo kernel is specialized to 16x16"
    hw = h * w
    p0 = conv0_patches_phase_major(x_nchw)                          # (n, 256, 9)
    args = (p0,) + tuple(packed)

    def const(shape):
        return pl.BlockSpec(shape, lambda b: (0,) * len(shape))

    in_specs = [
        pl.BlockSpec((1, hw, 9), lambda b: (b, 0, 0)),              # p0 per sample
        const((9, C0)), const((1, C0)),                             # w0, b0
        const((9 * C0, C1)), const((1, C1)),                        # w1, b1
        const((C0, C1)), const((1, C1)),                            # wsc, bsc
        const((9 * C1, C1)), const((1, C1)),                        # w2, b2
        const((C1, 10)), const((1, 10)),                            # fcw, fcb
    ]

    flops = 2 * n * (hw * 9 * C0 + M1 * 9 * C0 * C1 + M1 * C0 * C1
                     + M1 * 9 * C1 * C1 + M1 * C1 * 10)
    bytes_accessed = sum(int(a.size) * a.dtype.itemsize for a in args) + n * 10 * 4

    out = pl.pallas_call(
        resnet_fused_kernel,
        out_shape=jax.ShapeDtypeStruct((n, 1, 10), jnp.float32),
        grid_spec=pltpu.PrefetchScalarGridSpec(
            num_scalar_prefetch=0,
            grid=(n,),
            in_specs=in_specs,
            out_specs=pl.BlockSpec((1, 1, 10), lambda b: (b, 0, 0)),
            scratch_shapes=[pltpu.VMEM((M1, 9 * C0), jnp.bfloat16),   # conv1 patches
                            pltpu.VMEM((M1, 9 * C1), jnp.bfloat16)],  # conv2 patches
        ),
        compiler_params=pltpu.CompilerParams(
            dimension_semantics=("parallel",),
            vmem_limit_bytes=16 * 1024 * 1024),
        cost_estimate=pl.CostEstimate(flops=flops, transcendentals=0,
                                      bytes_accessed=int(bytes_accessed)),
    )(*args)
    return out.reshape(n, 10)


# ----------------------------------------------------------------------------
# Pure-JAX reference (f32) of the PyTorch module, eval-mode BN
# ----------------------------------------------------------------------------
def reference_forward(x_nchw, params):
    dn = ("NCHW", "OIHW", "NCHW")

    def conv(x, w, b, stride, pad):
        y = jax.lax.conv_general_dilated(x, w, (stride, stride),
                                         [(pad, pad), (pad, pad)],
                                         dimension_numbers=dn)
        return y + b.reshape(1, -1, 1, 1)

    def bn(x, p, eps=1e-5):
        gamma, beta, mean, var = (t.reshape(1, -1, 1, 1) for t in p)
        return (x - mean) / jnp.sqrt(var + eps) * gamma + beta

    x = x_nchw.astype(jnp.float32)
    y = jax.nn.relu(conv(x, params["conv0_w"], params["conv0_b"], 1, 1))
    out = jax.nn.relu(bn(conv(y, params["conv1_w"], params["conv1_b"], 2, 1),
                         params["bn1"]))
    out = bn(conv(out, params["conv2_w"], params["conv2_b"], 1, 1), params["bn2"])
    out = out + bn(conv(y, params["sc_w"], params["sc_b"], 2, 0), params["bn_sc"])
    out = jax.nn.relu(out)
    pooled = jnp.mean(out, axis=(2, 3))
    return pooled @ params["fc_w"] + params["fc_b"]


# ----------------------------------------------------------------------------
# Deterministic synthetic parameters (PyTorch layouts; eval-mode BN stats)
# TODO(synk): training-mode BatchNorm (batch statistics) is not implemented;
#             the kernel folds eval-mode running stats.
# ----------------------------------------------------------------------------
def init_params(key):
    ks = jax.random.split(key, 12)

    def w(k, shape, scale=0.1):
        return jax.random.normal(k, shape, jnp.float32) * scale

    def bn(k, c):
        k1, k2, k3, k4 = jax.random.split(k, 4)
        gamma = 1.0 + 0.1 * jax.random.normal(k1, (c,), jnp.float32)
        beta = 0.1 * jax.random.normal(k2, (c,), jnp.float32)
        mean = 0.1 * jax.random.normal(k3, (c,), jnp.float32)
        var = 1.0 + 0.1 * jnp.abs(jax.random.normal(k4, (c,), jnp.float32))
        return gamma, beta, mean, var

    return {
        "conv0_w": w(ks[0], (32, 1, 3, 3)), "conv0_b": w(ks[1], (32,)),
        "conv1_w": w(ks[2], (64, 32, 3, 3)), "conv1_b": w(ks[3], (64,)), "bn1": bn(ks[4], 64),
        "conv2_w": w(ks[5], (64, 64, 3, 3)), "conv2_b": w(ks[6], (64,)), "bn2": bn(ks[7], 64),
        "sc_w": w(ks[8], (64, 32, 1, 1)), "sc_b": w(ks[9], (64,)), "bn_sc": bn(ks[10], 64),
        "fc_w": w(ks[11], (64, 10)),                      # stored as PyTorch weight.T
        "fc_b": jnp.zeros((1, 10), jnp.float32),
    }


# ----------------------------------------------------------------------------
if __name__ == "__main__":
    key = jax.random.PRNGKey(0)
    k_x, k_p = jax.random.split(key)

    N, H, W = 2, 16, 16
    x = jax.random.normal(k_x, (N, 1, H, W), jnp.float32)   # NCHW, 1 input channel
    params = init_params(k_p)
    packed = pack_model(params)

    fwd = jax.jit(resnet_like_forward)
    out = jax.block_until_ready(fwd(x, packed))

    ref = reference_forward(x, params)
    err = float(jnp.max(jnp.abs(out - ref)))
    assert out.shape == (N, 10) and bool(jnp.all(jnp.isfinite(out)))
    assert err < 0.05, f"mismatch vs reference: max abs err {err}"
    print("KERNEL_OK")
</pallas_src>

<mosaic_0001>
module attributes {stable_mosaic.version = 11 : i64} {
  func.func @resnet_fused_kernel(%arg0: i32, %arg1: memref<1x256x9xbf16, #tpu.memory_space<vmem>>, %arg2: memref<9x32xbf16, #tpu.memory_space<vmem>>, %arg3: memref<1x32xf32, #tpu.memory_space<vmem>>, %arg4: memref<288x64xbf16, #tpu.memory_space<vmem>>, %arg5: memref<1x64xf32, #tpu.memory_space<vmem>>, %arg6: memref<32x64xbf16, #tpu.memory_space<vmem>>, %arg7: memref<1x64xf32, #tpu.memory_space<vmem>>, %arg8: memref<576x64xbf16, #tpu.memory_space<vmem>>, %arg9: memref<1x64xf32, #tpu.memory_space<vmem>>, %arg10: memref<64x10xbf16, #tpu.memory_space<vmem>>, %arg11: memref<1x10xf32, #tpu.memory_space<vmem>>, %arg12: memref<1x1x10xf32, #tpu.memory_space<vmem>>, %arg13: memref<64x288xbf16, #tpu.memory_space<vmem>>, %arg14: memref<64x576xbf16, #tpu.memory_space<vmem>>) attributes {dimension_semantics = [#tpu.dimension_semantics<parallel>], iteration_bounds = array<i64: 2>, scalar_prefetch = 0 : i64, scratch_operands = 2 : i64, tpu.core_type = #tpu.core_type<tc>, window_params = [{transform_indices = @transform_0, window_bounds = array<i64: 1, 256, 9>}, {pipeline_mode = #tpu.pipeline_mode<synchronous>, transform_indices = @transform_1, window_bounds = array<i64: 9, 32>}, {pipeline_mode = #tpu.pipeline_mode<synchronous>, transform_indices = @transform_2, window_bounds = array<i64: 1, 32>}, {pipeline_mode = #tpu.pipeline_mode<synchronous>, transform_indices = @transform_3, window_bounds = array<i64: 288, 64>}, {pipeline_mode = #tpu.pipeline_mode<synchronous>, transform_indices = @transform_4, window_bounds = array<i64: 1, 64>}, {pipeline_mode = #tpu.pipeline_mode<synchronous>, transform_indices = @transform_5, window_bounds = array<i64: 32, 64>}, {pipeline_mode = #tpu.pipeline_mode<synchronous>, transform_indices = @transform_6, window_bounds = array<i64: 1, 64>}, {pipeline_mode = #tpu.pipeline_mode<synchronous>, transform_indices = @transform_7, window_bounds = array<i64: 576, 64>}, {pipeline_mode = #tpu.pipeline_mode<synchronous>, transform_indices = @transform_8, window_bounds = array<i64: 1, 64>}, {pipeline_mode = #tpu.pipeline_mode<synchronous>, transform_indices = @transform_9, window_bounds = array<i64: 64, 10>}, {pipeline_mode = #tpu.pipeline_mode<synchronous>, transform_indices = @transform_10, window_bounds = array<i64: 1, 10>}, {transform_indices = @transform_11, window_bounds = array<i64: 1, 1, 10>}]} {
    %c0 = arith.constant 0 : index
    %c0_0 = arith.constant 0 : index
    %c0_1 = arith.constant 0 : index
    %0 = vector.load %arg1[%c0, %c0_0, %c0_1] : memref<1x256x9xbf16, #tpu.memory_space<vmem>>, vector<1x256x9xbf16>
    %1 = vector.shape_cast %0 : vector<1x256x9xbf16> to vector<256x9xbf16>
    %c0_2 = arith.constant 0 : index
    %c0_3 = arith.constant 0 : index
    %2 = vector.load %arg2[%c0_2, %c0_3] : memref<9x32xbf16, #tpu.memory_space<vmem>>, vector<9x32xbf16>
    %cst = arith.constant dense<0.000000e+00> : vector<256x32xf32>
    %3 = tpu.matmul %1, %2, %cst {dimension_numbers = #tpu.dot_dimension_numbers<[1], [0], [0], [1], [0, 0, 1, 1], [], []>} : vector<256x9xbf16>, vector<9x32xbf16>, vector<256x32xf32> -> vector<256x32xf32>
    %c0_4 = arith.constant 0 : index
    %c0_5 = arith.constant 0 : index
    %4 = vector.load %arg3[%c0_4, %c0_5] : memref<1x32xf32, #tpu.memory_space<vmem>>, vector<1x32xf32>
    %5 = vector.broadcast %4 : vector<1x32xf32> to vector<256x32xf32>
    %6 = arith.addf %3, %5 : vector<256x32xf32>
    %cst_6 = arith.constant 0.000000e+00 : f32
    %7 = vector.broadcast %cst_6 : f32 to vector<256x32xf32>
    %8 = arith.maximumf %6, %7 : vector<256x32xf32>
    %9 = tpu.iota {dimensions = array<i32: 0>} : vector<64x32xi32>
    %10 = tpu.iota {dimensions = array<i32: 0>} : vector<64x64xi32>
    %11 = vector.extract_strided_slice %8 {offsets = [192, 0], sizes = [64, 32], strides = [1, 1]} : vector<256x32xf32> to vector<64x32xf32>
    %c9_i32 = arith.constant 9 : i32
    %12 = tpu.dynamic_rotate %11 by %c9_i32 dim 0 : vector<64x32xf32>, i32 -> vector<64x32xf32>
    %c8_i32 = arith.constant 8 : i32
    %13 = vector.broadcast %c8_i32 : i32 to vector<64x32xi32>
    %14 = arith.cmpi sge, %9, %13 : vector<64x32xi32>
    %c7_i32 = arith.constant 7 : i32
    %15 = vector.broadcast %c7_i32 : i32 to vector<64x32xi32>
    %16 = arith.andi %9, %15 : vector<64x32xi32>
    %c0_i32 = arith.constant 0 : i32
    %17 = vector.broadcast %c0_i32 : i32 to vector<64x32xi32>
    %18 = arith.cmpi ne, %16, %17 : vector<64x32xi32>
    %19 = arith.andi %14, %18 : vector<64x32xi1>
    %cst_7 = arith.constant 0.000000e+00 : f32
    %20 = vector.broadcast %cst_7 : f32 to vector<64x32xf32>
    %21 = arith.select %19, %12, %20 : vector<64x32xi1>, vector<64x32xf32>
    %22 = arith.truncf %21 : vector<64x32xf32> to vector<64x32xbf16>
    %c0_8 = arith.constant 0 : index
    %c0_9 = arith.constant 0 : index
    %23 = vector.load %arg13[%c0_8, %c0_9] : memref<64x288xbf16, #tpu.memory_space<vmem>>, vector<64x32xbf16>
    tpu.vector_store %arg13[%c0_8, %c0_9], %22 {strides = array<i32>} : memref<64x288xbf16, #tpu.memory_space<vmem>>, vector<64x32xbf16>,
    %24 = vector.extract_strided_slice %8 {offsets = [128, 0], sizes = [64, 32], strides = [1, 1]} : vector<256x32xf32> to vector<64x32xf32>
    %c8_i32_10 = arith.constant 8 : i32
    %25 = tpu.dynamic_rotate %24 by %c8_i32_10 dim 0 : vector<64x32xf32>, i32 -> vector<64x32xf32>
    %c8_i32_11 = arith.constant 8 : i32
    %26 = vector.broadcast %c8_i32_11 : i32 to vector<64x32xi32>
    %27 = arith.cmpi sge, %9, %26 : vector<64x32xi32>
    %cst_12 = arith.constant 0.000000e+00 : f32
    %28 = vector.broadcast %cst_12 : f32 to vector<64x32xf32>
    %29 = arith.select %27, %25, %28 : vector<64x32xi1>, vector<64x32xf32>
    %30 = arith.truncf %29 : vector<64x32xf32> to vector<64x32xbf16>
    %c0_13 = arith.constant 0 : index
    %c32 = arith.constant 32 : index
    %31 = vector.load %arg13[%c0_13, %c32] : memref<64x288xbf16, #tpu.memory_space<vmem>>, vector<64x32xbf16>
    tpu.vector_store %arg13[%c0_13, %c32], %30 {strides = array<i32>} : memref<64x288xbf16, #tpu.memory_space<vmem>>, vector<64x32xbf16>,
    %32 = vector.extract_strided_slice %8 {offsets = [192, 0], sizes = [64, 32], strides = [1, 1]} : vector<256x32xf32> to vector<64x32xf32>
    %c8_i32_14 = arith.constant 8 : i32
    %33 = tpu.dynamic_rotate %32 by %c8_i32_14 dim 0 : vector<64x32xf32>, i32 -> vector<64x32xf32>
    %c8_i32_15 = arith.constant 8 : i32
    %34 = vector.broadcast %c8_i32_15 : i32 to vector<64x32xi32>
    %35 = arith.cmpi sge, %9, %34 : vector<64x32xi32>
    %cst_16 = arith.constant 0.000000e+00 : f32
    %36 = vector.broadcast %cst_16 : f32 to vector<64x32xf32>
    %37 = arith.select %35, %33, %36 : vector<64x32xi1>, vector<64x32xf32>
    %38 = arith.truncf %37 : vector<64x32xf32> to vector<64x32xbf16>
    %c0_17 = arith.constant 0 : index
    %c64 = arith.constant 64 : index
    %39 = vector.load %arg13[%c0_17, %c64] : memref<64x288xbf16, #tpu.memory_space<vmem>>, vector<64x32xbf16>
    tpu.vector_store %arg13[%c0_17, %c64], %38 {strides = array<i32>} : memref<64x288xbf16, #tpu.memory_space<vmem>>, vector<64x32xbf16>,
    %40 = vector.extract_strided_slice %8 {offsets = [64, 0], sizes = [64, 32], strides = [1, 1]} : vector<256x32xf32> to vector<64x32xf32>
    %c1_i32 = arith.constant 1 : i32
    %41 = tpu.dynamic_rotate %40 by %c1_i32 dim 0 : vector<64x32xf32>, i32 -> vector<64x32xf32>
    %c7_i32_18 = arith.constant 7 : i32
    %42 = vector.broadcast %c7_i32_18 : i32 to vector<64x32xi32>
    %43 = arith.andi %9, %42 : vector<64x32xi32>
    %c0_i32_19 = arith.constant 0 : i32
    %44 = vector.broadcast %c0_i32_19 : i32 to vector<64x32xi32>
    %45 = arith.cmpi ne, %43, %44 : vector<64x32xi32>
    %cst_20 = arith.constant 0.000000e+00 : f32
    %46 = vector.broadcast %cst_20 : f32 to vector<64x32xf32>
    %47 = arith.select %45, %41, %46 : vector<64x32xi1>, vector<64x32xf32>
    %48 = arith.truncf %47 : vector<64x32xf32> to vector<64x32xbf16>
    %c0_21 = arith.constant 0 : index
    %c96 = arith.constant 96 : index
    %49 = vector.load %arg13[%c0_21, %c96] : memref<64x288xbf16, #tpu.memory_space<vmem>>, vector<64x32xbf16>
    tpu.vector_store %arg13[%c0_21, %c96], %48 {strides = array<i32>} : memref<64x288xbf16, #tpu.memory_space<vmem>>, vector<64x32xbf16>,
    %50 = vector.extract_strided_slice %8 {offsets = [0, 0], sizes = [64, 32], strides = [1, 1]} : vector<256x32xf32> to vector<64x32xf32>
    %51 = arith.truncf %50 : vector<64x32xf32> to vector<64x32xbf16>
    %c0_22 = arith.constant 0 : index
    %c128 = arith.constant 128 : index
    %52 = vector.load %arg13[%c0_22, %c128] : memref<64x288xbf16, #tpu.memory_space<vmem>>, vector<64x32xbf16>
    tpu.vector_store %arg13[%c0_22, %c128], %51 {strides = array<i32>} : memref<64x288xbf16, #tpu.memory_space<vmem>>, vector<64x32xbf16>,
    %53 = vector.extract_strided_slice %8 {offsets = [64, 0], sizes = [64, 32], strides = [1, 1]} : vector<256x32xf32> to vector<64x32xf32>
    %54 = arith.truncf %53 : vector<64x32xf32> to vector<64x32xbf16>
    %c0_23 = arith.constant 0 : index
    %c160 = arith.constant 160 : index
    %55 = vector.load %arg13[%c0_23, %c160] : memref<64x288xbf16, #tpu.memory_space<vmem>>, vector<64x32xbf16>
    tpu.vector_store %arg13[%c0_23, %c160], %54 {strides = array<i32>} : memref<64x288xbf16, #tpu.memory_space<vmem>>, vector<64x32xbf16>,
    %56 = vector.extract_strided_slice %8 {offsets = [192, 0], sizes = [64, 32], strides = [1, 1]} : vector<256x32xf32> to vector<64x32xf32>
    %c1_i32_24 = arith.constant 1 : i32
    %57 = tpu.dynamic_rotate %56 by %c1_i32_24 dim 0 : vector<64x32xf32>, i32 -> vector<64x32xf32>
    %c7_i32_25 = arith.constant 7 : i32
    %58 = vector.broadcast %c7_i32_25 : i32 to vector<64x32xi32>
    %59 = arith.andi %9, %58 : vector<64x32xi32>
    %c0_i32_26 = arith.constant 0 : i32
    %60 = vector.broadcast %c0_i32_26 : i32 to vector<64x32xi32>
    %61 = arith.cmpi ne, %59, %60 : vector<64x32xi32>
    %cst_27 = arith.constant 0.000000e+00 : f32
    %62 = vector.broadcast %cst_27 : f32 to vector<64x32xf32>
    %63 = arith.select %61, %57, %62 : vector<64x32xi1>, vector<64x32xf32>
    %64 = arith.truncf %63 : vector<64x32xf32> to vector<64x32xbf16>
    %c0_28 = arith.constant 0 : index
    %c192 = arith.constant 192 : index
    %65 = vector.load %arg13[%c0_28, %c192] : memref<64x288xbf16, #tpu.memory_space<vmem>>, vector<64x32xbf16>
    tpu.vector_store %arg13[%c0_28, %c192], %64 {strides = array<i32>} : memref<64x288xbf16, #tpu.memory_space<vmem>>, vector<64x32xbf16>,
    %66 = vector.extract_strided_slice %8 {offsets = [128, 0], sizes = [64, 32], strides = [1, 1]} : vector<256x32xf32> to vector<64x32xf32>
    %67 = arith.truncf %66 : vector<64x32xf32> to vector<64x32xbf16>
    %c0_29 = arith.constant 0 : index
    %c224 = arith.constant 224 : index
    %68 = vector.load %arg13[%c0_29, %c224] : memref<64x288xbf16, #tpu.memory_space<vmem>>, vector<64x32xbf16>
    tpu.vector_store %arg13[%c0_29, %c224], %67 {strides = array<i32>} : memref<64x288xbf16, #tpu.memory_space<vmem>>, vector<64x32xbf16>,
    %69 = vector.extract_strided_slice %8 {offsets = [192, 0], sizes = [64, 32], strides = [1, 1]} : vector<256x32xf32> to vector<64x32xf32>
    %70 = arith.truncf %69 : vector<64x32xf32> to vector<64x32xbf16>
    %c0_30 = arith.constant 0 : index
    %c256 = arith.constant 256 : index
    %71 = vector.load %arg13[%c0_30, %c256] : memref<64x288xbf16, #tpu.memory_space<vmem>>, vector<64x32xbf16>
    tpu.vector_store %arg13[%c0_30, %c256], %70 {strides = array<i32>} : memref<64x288xbf16, #tpu.memory_space<vmem>>, vector<64x32xbf16>,
    %c0_31 = arith.constant 0 : index
    %c0_32 = arith.constant 0 : index
    %72 = vector.load %arg13[%c0_31, %c0_32] : memref<64x288xbf16, #tpu.memory_space<vmem>>, vector<64x288xbf16>
    %c0_33 = arith.constant 0 : index
    %c0_34 = arith.constant 0 : index
    %73 = vector.load %arg4[%c0_33, %c0_34] : memref<288x64xbf16, #tpu.memory_space<vmem>>, vector<288x64xbf16>
    %cst_35 = arith.constant dense<0.000000e+00> : vector<64x64xf32>
    %74 = tpu.matmul %72, %73, %cst_35 {dimension_numbers = #tpu.dot_dimension_numbers<[1], [0], [0], [1], [0, 0, 1, 1], [], []>} : vector<64x288xbf16>, vector<288x64xbf16>, vector<64x64xf32> -> vector<64x64xf32>
    %c0_36 = arith.constant 0 : index
    %c0_37 = arith.constant 0 : index
    %75 = vector.load %arg5[%c0_36, %c0_37] : memref<1x64xf32, #tpu.memory_space<vmem>>, vector<1x64xf32>
    %76 = vector.broadcast %75 : vector<1x64xf32> to vector<64x64xf32>
    %77 = arith.addf %74, %76 : vector<64x64xf32>
    %cst_38 = arith.constant 0.000000e+00 : f32
    %78 = vector.broadcast %cst_38 : f32 to vector<64x64xf32>
    %79 = arith.maximumf %77, %78 : vector<64x64xf32>
    %80 = vector.extract_strided_slice %8 {offsets = [0, 0], sizes = [64, 32], strides = [1, 1]} : vector<256x32xf32> to vector<64x32xf32>
    %81 = arith.truncf %80 : vector<64x32xf32> to vector<64x32xbf16>
    %c0_39 = arith.constant 0 : index
    %c0_40 = arith.constant 0 : index
    %82 = vector.load %arg6[%c0_39, %c0_40] : memref<32x64xbf16, #tpu.memory_space<vmem>>, vector<32x64xbf16>
    %cst_41 = arith.constant dense<0.000000e+00> : vector<64x64xf32>
    %83 = tpu.matmul %81, %82, %cst_41 {dimension_numbers = #tpu.dot_dimension_numbers<[1], [0], [0], [1], [0, 0, 1, 1], [], []>} : vector<64x32xbf16>, vector<32x64xbf16>, vector<64x64xf32> -> vector<64x64xf32>
    %c0_42 = arith.constant 0 : index
    %c0_43 = arith.constant 0 : index
    %84 = vector.load %arg7[%c0_42, %c0_43] : memref<1x64xf32, #tpu.memory_space<vmem>>, vector<1x64xf32>
    %85 = vector.broadcast %84 : vector<1x64xf32> to vector<64x64xf32>
    %86 = arith.addf %83, %85 : vector<64x64xf32>
    %c9_i32_44 = arith.constant 9 : i32
    %87 = tpu.dynamic_rotate %79 by %c9_i32_44 dim 0 : vector<64x64xf32>, i32 -> vector<64x64xf32>
    %c8_i32_45 = arith.constant 8 : i32
    %88 = vector.broadcast %c8_i32_45 : i32 to vector<64x64xi32>
    %89 = arith.cmpi sge, %10, %88 : vector<64x64xi32>
    %c7_i32_46 = arith.constant 7 : i32
    %90 = vector.broadcast %c7_i32_46 : i32 to vector<64x64xi32>
    %91 = arith.andi %10, %90 : vector<64x64xi32>
    %c0_i32_47 = arith.constant 0 : i32
    %92 = vector.broadcast %c0_i32_47 : i32 to vector<64x64xi32>
    %93 = arith.cmpi ne, %91, %92 : vector<64x64xi32>
    %94 = arith.andi %89, %93 : vector<64x64xi1>
    %cst_48 = arith.constant 0.000000e+00 : f32
    %95 = vector.broadcast %cst_48 : f32 to vector<64x64xf32>
    %96 = arith.select %94, %87, %95 : vector<64x64xi1>, vector<64x64xf32>
    %97 = arith.truncf %96 : vector<64x64xf32> to vector<64x64xbf16>
    %c0_49 = arith.constant 0 : index
    %c0_50 = arith.constant 0 : index
    %98 = vector.load %arg14[%c0_49, %c0_50] : memref<64x576xbf16, #tpu.memory_space<vmem>>, vector<64x64xbf16>
    tpu.vector_store %arg14[%c0_49, %c0_50], %97 {strides = array<i32>} : memref<64x576xbf16, #tpu.memory_space<vmem>>, vector<64x64xbf16>,
    %c8_i32_51 = arith.constant 8 : i32
    %99 = tpu.dynamic_rotate %79 by %c8_i32_51 dim 0 : vector<64x64xf32>, i32 -> vector<64x64xf32>
    %c8_i32_52 = arith.constant 8 : i32
    %100 = vector.broadcast %c8_i32_52 : i32 to vector<64x64xi32>
    %101 = arith.cmpi sge, %10, %100 : vector<64x64xi32>
    %cst_53 = arith.constant 0.000000e+00 : f32
    %102 = vector.broadcast %cst_53 : f32 to vector<64x64xf32>
    %103 = arith.select %101, %99, %102 : vector<64x64xi1>, vector<64x64xf32>
    %104 = arith.truncf %103 : vector<64x64xf32> to vector<64x64xbf16>
    %c0_54 = arith.constant 0 : index
    %c64_55 = arith.constant 64 : index
    %105 = vector.load %arg14[%c0_54, %c64_55] : memref<64x576xbf16, #tpu.memory_space<vmem>>, vector<64x64xbf16>
    tpu.vector_store %arg14[%c0_54, %c64_55], %104 {strides = array<i32>} : memref<64x576xbf16, #tpu.memory_space<vmem>>, vector<64x64xbf16>,
    %c7_i32_56 = arith.constant 7 : i32
    %106 = tpu.dynamic_rotate %79 by %c7_i32_56 dim 0 : vector<64x64xf32>, i32 -> vector<64x64xf32>
    %c8_i32_57 = arith.constant 8 : i32
    %107 = vector.broadcast %c8_i32_57 : i32 to vector<64x64xi32>
    %108 = arith.cmpi sge, %10, %107 : vector<64x64xi32>
    %c7_i32_58 = arith.constant 7 : i32
    %109 = vector.broadcast %c7_i32_58 : i32 to vector<64x64xi32>
    %110 = arith.andi %10, %109 : vector<64x64xi32>
    %c7_i32_59 = arith.constant 7 : i32
    %111 = vector.broadcast %c7_i32_59 : i32 to vector<64x64xi32>
    %112 = arith.cmpi ne, %110, %111 : vector<64x64xi32>
    %113 = arith.andi %108, %112 : vector<64x64xi1>
    %cst_60 = arith.constant 0.000000e+00 : f32
    %114 = vector.broadcast %cst_60 : f32 to vector<64x64xf32>
    %115 = arith.select %113, %106, %114 : vector<64x64xi1>, vector<64x64xf32>
    %116 = arith.truncf %115 : vector<64x64xf32> to vector<64x64xbf16>
    %c0_61 = arith.constant 0 : index
    %c128_62 = arith.constant 128 : index
    %117 = vector.load %arg14[%c0_61, %c128_62] : memref<64x576xbf16, #tpu.memory_space<vmem>>, vector<64x64xbf16>
    tpu.vector_store %arg14[%c0_61, %c128_62], %116 {strides = array<i32>} : memref<64x576xbf16, #tpu.memory_space<vmem>>, vector<64x64xbf16>,
    %c1_i32_63 = arith.constant 1 : i32
    %118 = tpu.dynamic_rotate %79 by %c1_i32_63 dim 0 : vector<64x64xf32>, i32 -> vector<64x64xf32>
    %c7_i32_64 = arith.constant 7 : i32
    %119 = vector.broadcast %c7_i32_64 : i32 to vector<64x64xi32>
    %120 = arith.andi %10, %119 : vector<64x64xi32>
    %c0_i32_65 = arith.constant 0 : i32
    %121 = vector.broadcast %c0_i32_65 : i32 to vector<64x64xi32>
    %122 = arith.cmpi ne, %120, %121 : vector<64x64xi32>
    %cst_66 = arith.constant 0.000000e+00 : f32
    %123 = vector.broadcast %cst_66 : f32 to vector<64x64xf32>
    %124 = arith.select %122, %118, %123 : vector<64x64xi1>, vector<64x64xf32>
    %125 = arith.truncf %124 : vector<64x64xf32> to vector<64x64xbf16>
    %c0_67 = arith.constant 0 : index
    %c192_68 = arith.constant 192 : index
    %126 = vector.load %arg14[%c0_67, %c192_68] : memref<64x576xbf16, #tpu.memory_space<vmem>>, vector<64x64xbf16>
    tpu.vector_store %arg14[%c0_67, %c192_68], %125 {strides = array<i32>} : memref<64x576xbf16, #tpu.memory_space<vmem>>, vector<64x64xbf16>,
    %127 = arith.truncf %79 : vector<64x64xf32> to vector<64x64xbf16>
    %c0_69 = arith.constant 0 : index
    %c256_70 = arith.constant 256 : index
    %128 = vector.load %arg14[%c0_69, %c256_70] : memref<64x576xbf16, #tpu.memory_space<vmem>>, vector<64x64xbf16>
    tpu.vector_store %arg14[%c0_69, %c256_70], %127 {strides = array<i32>} : memref<64x576xbf16, #tpu.memory_space<vmem>>, vector<64x64xbf16>,
    %c63_i32 = arith.constant 63 : i32
    %129 = tpu.dynamic_rotate %79 by %c63_i32 dim 0 : vector<64x64xf32>, i32 -> vector<64x64xf32>
    %c7_i32_71 = arith.constant 7 : i32
    %130 = vector.broadcast %c7_i32_71 : i32 to vector<64x64xi32>
    %131 = arith.andi %10, %130 : vector<64x64xi32>
    %c7_i32_72 = arith.constant 7 : i32
    %132 = vector.broadcast %c7_i32_72 : i32 to vector<64x64xi32>
    %133 = arith.cmpi ne, %131, %132 : vector<64x64xi32>
    %cst_73 = arith.constant 0.000000e+00 : f32
    %134 = vector.broadcast %cst_73 : f32 to vector<64x64xf32>
    %135 = arith.select %133, %129, %134 : vector<64x64xi1>, vector<64x64xf32>
    %136 = arith.truncf %135 : vector<64x64xf32> to vector<64x64xbf16>
    %c0_74 = arith.constant 0 : index
    %c320 = arith.constant 320 : index
    %137 = vector.load %arg14[%c0_74, %c320] : memref<64x576xbf16, #tpu.memory_space<vmem>>, vector<64x64xbf16>
    tpu.vector_store %arg14[%c0_74, %c320], %136 {strides = array<i32>} : memref<64x576xbf16, #tpu.memory_space<vmem>>, vector<64x64xbf16>,
    %c57_i32 = arith.constant 57 : i32
    %138 = tpu.dynamic_rotate %79 by %c57_i32 dim 0 : vector<64x64xf32>, i32 -> vector<64x64xf32>
    %c56_i32 = arith.constant 56 : i32
    %139 = vector.broadcast %c56_i32 : i32 to vector<64x64xi32>
    %140 = arith.cmpi slt, %10, %139 : vector<64x64xi32>
    %c7_i32_75 = arith.constant 7 : i32
    %141 = vector.broadcast %c7_i32_75 : i32 to vector<64x64xi32>
    %142 = arith.andi %10, %141 : vector<64x64xi32>
    %c0_i32_76 = arith.constant 0 : i32
    %143 = vector.broadcast %c0_i32_76 : i32 to vector<64x64xi32>
    %144 = arith.cmpi ne, %142, %143 : vector<64x64xi32>
    %145 = arith.andi %140, %144 : vector<64x64xi1>
    %cst_77 = arith.constant 0.000000e+00 : f32
    %146 = vector.broadcast %cst_77 : f32 to vector<64x64xf32>
    %147 = arith.select %145, %138, %146 : vector<64x64xi1>, vector<64x64xf32>
    %148 = arith.truncf %147 : vector<64x64xf32> to vector<64x64xbf16>
    %c0_78 = arith.constant 0 : index
    %c384 = arith.constant 384 : index
    %149 = vector.load %arg14[%c0_78, %c384] : memref<64x576xbf16, #tpu.memory_space<vmem>>, vector<64x64xbf16>
    tpu.vector_store %arg14[%c0_78, %c384], %148 {strides = array<i32>} : memref<64x576xbf16, #tpu.memory_space<vmem>>, vector<64x64xbf16>,
    %c56_i32_79 = arith.constant 56 : i32
    %150 = tpu.dynamic_rotate %79 by %c56_i32_79 dim 0 : vector<64x64xf32>, i32 -> vector<64x64xf32>
    %c56_i32_80 = arith.constant 56 : i32
    %151 = vector.broadcast %c56_i32_80 : i32 to vector<64x64xi32>
    %152 = arith.cmpi slt, %10, %151 : vector<64x64xi32>
    %cst_81 = arith.constant 0.000000e+00 : f32
    %153 = vector.broadcast %cst_81 : f32 to vector<64x64xf32>
    %154 = arith.select %152, %150, %153 : vector<64x64xi1>, vector<64x64xf32>
    %155 = arith.truncf %154 : vector<64x64xf32> to vector<64x64xbf16>
    %c0_82 = arith.constant 0 : index
    %c448 = arith.constant 448 : index
    %156 = vector.load %arg14[%c0_82, %c448] : memref<64x576xbf16, #tpu.memory_space<vmem>>, vector<64x64xbf16>
    tpu.vector_store %arg14[%c0_82, %c448], %155 {strides = array<i32>} : memref<64x576xbf16, #tpu.memory_space<vmem>>, vector<64x64xbf16>,
    %c55_i32 = arith.constant 55 : i32
    %157 = tpu.dynamic_rotate %79 by %c55_i32 dim 0 : vector<64x64xf32>, i32 -> vector<64x64xf32>
    %c56_i32_83 = arith.constant 56 : i32
    %158 = vector.broadcast %c56_i32_83 : i32 to vector<64x64xi32>
    %159 = arith.cmpi slt, %10, %158 : vector<64x64xi32>
    %c7_i32_84 = arith.constant 7 : i32
    %160 = vector.broadcast %c7_i32_84 : i32 to vector<64x64xi32>
    %161 = arith.andi %10, %160 : vector<64x64xi32>
    %c7_i32_85 = arith.constant 7 : i32
    %162 = vector.broadcast %c7_i32_85 : i32 to vector<64x64xi32>
    %163 = arith.cmpi ne, %161, %162 : vector<64x64xi32>
    %164 = arith.andi %159, %163 : vector<64x64xi1>
    %cst_86 = arith.constant 0.000000e+00 : f32
    %165 = vector.broadcast %cst_86 : f32 to vector<64x64xf32>
    %166 = arith.select %164, %157, %165 : vector<64x64xi1>, vector<64x64xf32>
    %167 = arith.truncf %166 : vector<64x64xf32> to vector<64x64xbf16>
    %c0_87 = arith.constant 0 : index
    %c512 = arith.constant 512 : index
    %168 = vector.load %arg14[%c0_87, %c512] : memref<64x576xbf16, #tpu.memory_space<vmem>>, vector<64x64xbf16>
    tpu.vector_store %arg14[%c0_87, %c512], %167 {strides = array<i32>} : memref<64x576xbf16, #tpu.memory_space<vmem>>, vector<64x64xbf16>,
    %c0_88 = arith.constant 0 : index
    %c0_89 = arith.constant 0 : index
    %169 = vector.load %arg14[%c0_88, %c0_89] : memref<64x576xbf16, #tpu.memory_space<vmem>>, vector<64x576xbf16>
    %c0_90 = arith.constant 0 : index
    %c0_91 = arith.constant 0 : index
    %170 = vector.load %arg8[%c0_90, %c0_91] : memref<576x64xbf16, #tpu.memory_space<vmem>>, vector<576x64xbf16>
    %cst_92 = arith.constant dense<0.000000e+00> : vector<64x64xf32>
    %171 = tpu.matmul %169, %170, %cst_92 {dimension_numbers = #tpu.dot_dimension_numbers<[1], [0], [0], [1], [0, 0, 1, 1], [], []>} : vector<64x576xbf16>, vector<576x64xbf16>, vector<64x64xf32> -> vector<64x64xf32>
    %c0_93 = arith.constant 0 : index
    %c0_94 = arith.constant 0 : index
    %172 = vector.load %arg9[%c0_93, %c0_94] : memref<1x64xf32, #tpu.memory_space<vmem>>, vector<1x64xf32>
    %173 = vector.broadcast %172 : vector<1x64xf32> to vector<64x64xf32>
    %174 = arith.addf %171, %173 : vector<64x64xf32>
    %175 = arith.addf %174, %86 : vector<64x64xf32>
    %cst_95 = arith.constant 0.000000e+00 : f32
    %176 = vector.broadcast %cst_95 : f32 to vector<64x64xf32>
    %177 = arith.maximumf %175, %176 : vector<64x64xf32>
    %178 = arith.truncf %177 : vector<64x64xf32> to vector<64x64xbf16>
    %c0_96 = arith.constant 0 : index
    %c0_97 = arith.constant 0 : index
    %179 = vector.load %arg10[%c0_96, %c0_97] : memref<64x10xbf16, #tpu.memory_space<vmem>>, vector<64x10xbf16>
    %cst_98 = arith.constant dense<0.000000e+00> : vector<64x10xf32>
    %180 = tpu.matmul %178, %179, %cst_98 {dimension_numbers = #tpu.dot_dimension_numbers<[1], [0], [0], [1], [0, 0, 1, 1], [], []>} : vector<64x64xbf16>, vector<64x10xbf16>, vector<64x10xf32> -> vector<64x10xf32>
    %cst_99 = arith.constant dense<0.000000e+00> : vector<10xf32>
    %181 = vector.multi_reduction <add>, %180, %cst_99 [0] : vector<64x10xf32> to vector<10xf32>
    %182 = vector.shape_cast %181 : vector<10xf32> to vector<1x10xf32>
    %cst_100 = arith.constant 1.562500e-02 : f32
    %183 = vector.broadcast %cst_100 : f32 to vector<1x10xf32>
    %184 = arith.mulf %182, %183 : vector<1x10xf32>
    %c0_101 = arith.constant 0 : index
    %c0_102 = arith.constant 0 : index
    %185 = vector.load %arg11[%c0_101, %c0_102] : memref<1x10xf32, #tpu.memory_space<vmem>>, vector<1x10xf32>
    %186 = arith.addf %184, %185 : vector<1x10xf32>
    %c0_103 = arith.constant 0 : index
    %c0_104 = arith.constant 0 : index
    %c0_105 = arith.constant 0 : index
    %187 = vector.load %arg12[%c0_103, %c0_104, %c0_105] : memref<1x1x10xf32, #tpu.memory_space<vmem>>, vector<1x1x10xf32>
    %188 = vector.shape_cast %187 : vector<1x1x10xf32> to vector<1x10xf32>
    %189 = vector.shape_cast %186 : vector<1x10xf32> to vector<1x1x10xf32>
    tpu.vector_store %arg12[%c0_103, %c0_104, %c0_105], %189 {strides = array<i32>} : memref<1x1x10xf32, #tpu.memory_space<vmem>>, vector<1x1x10xf32>,
    return
  }
  func.func @transform_0(%arg0: i32) -> (i32, i32, i32) {
    %c0_i32 = arith.constant 0 : i32
    %c0_i32_0 = arith.constant 0 : i32
    %c0_i32_1 = arith.constant 0 : i32
    return %arg0, %c0_i32, %c0_i32_0 : i32, i32, i32
  }
  func.func @transform_1(%arg0: i32) -> (i32, i32) {
    %c0_i32 = arith.constant 0 : i32
    %c0_i32_0 = arith.constant 0 : i32
    %c0_i32_1 = arith.constant 0 : i32
    return %c0_i32, %c0_i32_0 : i32, i32
  }
  func.func @transform_2(%arg0: i32) -> (i32, i32) {
    %c0_i32 = arith.constant 0 : i32
    %c0_i32_0 = arith.constant 0 : i32
    %c0_i32_1 = arith.constant 0 : i32
    return %c0_i32, %c0_i32_0 : i32, i32
  }
  func.func @transform_3(%arg0: i32) -> (i32, i32) {
    %c0_i32 = arith.constant 0 : i32
    %c0_i32_0 = arith.constant 0 : i32
    %c0_i32_1 = arith.constant 0 : i32
    return %c0_i32, %c0_i32_0 : i32, i32
  }
  func.func @transform_4(%arg0: i32) -> (i32, i32) {
    %c0_i32 = arith.constant 0 : i32
    %c0_i32_0 = arith.constant 0 : i32
    %c0_i32_1 = arith.constant 0 : i32
    return %c0_i32, %c0_i32_0 : i32, i32
  }
  func.func @transform_5(%arg0: i32) -> (i32, i32) {
    %c0_i32 = arith.constant 0 : i32
    %c0_i32_0 = arith.constant 0 : i32
    %c0_i32_1 = arith.constant 0 : i32
    return %c0_i32, %c0_i32_0 : i32, i32
  }
  func.func @transform_6(%arg0: i32) -> (i32, i32) {
    %c0_i32 = arith.constant 0 : i32
    %c0_i32_0 = arith.constant 0 : i32
    %c0_i32_1 = arith.constant 0 : i32
    return %c0_i32, %c0_i32_0 : i32, i32
  }
  func.func @transform_7(%arg0: i32) -> (i32, i32) {
    %c0_i32 = arith.constant 0 : i32
    %c0_i32_0 = arith.constant 0 : i32
    %c0_i32_1 = arith.constant 0 : i32
    return %c0_i32, %c0_i32_0 : i32, i32
  }
  func.func @transform_8(%arg0: i32) -> (i32, i32) {
    %c0_i32 = arith.constant 0 : i32
    %c0_i32_0 = arith.constant 0 : i32
    %c0_i32_1 = arith.constant 0 : i32
    return %c0_i32, %c0_i32_0 : i32, i32
  }
  func.func @transform_9(%arg0: i32) -> (i32, i32) {
    %c0_i32 = arith.constant 0 : i32
    %c0_i32_0 = arith.constant 0 : i32
    %c0_i32_1 = arith.constant 0 : i32
    return %c0_i32, %c0_i32_0 : i32, i32
  }
  func.func @transform_10(%arg0: i32) -> (i32, i32) {
    %c0_i32 = arith.constant 0 : i32
    %c0_i32_0 = arith.constant 0 : i32
    %c0_i32_1 = arith.constant 0 : i32
    return %c0_i32, %c0_i32_0 : i32, i32
  }
  func.func @transform_11(%arg0: i32) -> (i32, i32, i32) {
    %c0_i32 = arith.constant 0 : i32
    %c0_i32_0 = arith.constant 0 : i32
    %c0_i32_1 = arith.constant 0 : i32
    return %arg0, %c0_i32, %c0_i32_0 : i32, i32, i32
  }
}

</mosaic_0001>

<bundles_post_ra>
// kernel: resnet_like_forward.1
= control target key start
LH: loop header
LB: loop body
LE: loop exit
PB: predicated region body
PF: predicated region fallthrough
CT: control target
= control target key end

     0   :  { %s4178_s0 = inlined_call_operand.vmem [shape: bf16[2,256,9], index: 0, kind: input, shape index: {}]   ;;  %s4179_s1 = inlined_call_operand.vmem [shape: bf16[9,32], index: 1, kind: input, shape index: {}]   ;;  %s4180_s2 = inlined_call_operand.vmem [shape: f32[1,32], index: 2, kind: input, shape index: {}]   ;;  %s4181_s3 = inlined_call_operand.vmem [shape: bf16[288,64], index: 3, kind: input, shape index: {}]   ;;  %s4182_s4 = inlined_call_operand.vmem [shape: f32[1,64], index: 4, kind: input, shape index: {}]   ;;  %s4183_s5 = inlined_call_operand.vmem [shape: bf16[32,64], index: 5, kind: input, shape index: {}]   ;;  %s4184_s6 = inlined_call_operand.vmem [shape: f32[1,64], index: 6, kind: input, shape index: {}]   ;;  %s4185_s7 = inlined_call_operand.vmem [shape: bf16[576,64], index: 7, kind: input, shape index: {}]   ;;  %s4186_s8 = inlined_call_operand.vmem [shape: f32[1,64], index: 8, kind: input, shape index: {}]   ;;  %s4187_s9 = inlined_call_operand.vmem [shape: bf16[64,10], index: 9, kind: input, shape index: {}]   ;;  %s4188_s10 = inlined_call_operand.vmem [shape: f32[1,10], index: 10, kind: input, shape index: {}]   ;;  %s4189_s11 = inlined_call_operand.hbm [shape: f32[2,1,10], index: 11, kind: output, shape index: {}]  }
   0x1   :  { %4199 = sst [smem:[#allocation7_spill]] %s4178_s0 }
   0x2   :  { %16 = vsyncpa [#allocation5], 0 }
   0x3   :  { %18 = vsyncpa [#allocation5 + $0x1], 0  ;;  %s3133_s17 = smov 0   ;;  %s3135_s18 = smov 0  }
   0x4   :  { %s3137_s19 = smov 0   ;;  %s3139_s20 = smov 0  }
   0x5 LB: > { %s3154_s21 = sadd.s32 4294967295, %s3065_s20   ;;  %s2480_s22 = sadd.s32 4294967294, %s3065_s20   ;;  %s3065_s20 = sphi %s3139_s20, %s4277_s20   ;;  %s3061_s19 = sphi %s3137_s19, %s4276_s19   ;;  %s3057_s18 = sphi %s3135_s18, %s4275_s18   ;;  %s3053_s17 = sphi %s3133_s17, %s4274_s17  }
   0x6   : > { %s3158_s23 = sadd.s32 1, %s3065_s20   ;;  %s267_s24 = sadd.s32 1, %s3061_s19 }
   0x7   : > { %s264_s25 = ssub.s32 %s3065_s20, %s3158_s23  ;;  %p277_p0 = scmp.ne.s32.totalorder %s3061_s19, %s3057_s18 }
   0x8   : > { %p265_p1 = scmp.eq.s32.totalorder %s264_s25, 0  ;;  %p278_p2 = scmp.eq.s32.totalorder %s3154_s21, 1 }
   0x9   : > { %p283_p3 = scmp.ne.s32.totalorder %s3057_s18, %s3053_s17  ;;  %p284_p4 = scmp.eq.s32.totalorder %s2480_s22, 1 }
   0xa   : > { %s3169_s26 = scalar_select %p265_p1, %s3061_s19, %s267_s24  }
   0xb   : > { %p3171_p5 = por %p278_p2, %p277_p0  ;;  %p3175_p6 = por %p284_p4, %p283_p3 }
   0xc   : > { %p2483_p7 = scmp.ge.s32.totalorder %s3065_s20, 1  ;;  %p340_p8 = scmp.lt.s32.totalorder %s3065_s20, 3 }
   0xe   : > { %p341_p9 = pnand %p2483_p7, %p340_p8 }
   0xf   : > { %v2926_v0 = vld [vmem:[%s4179_s1] sm:$0x1f] (!%p341_p9)   ;;  %vm560_vm0 = vcmask (!%p341_p9), 1043456   ;;  %vm561_vm1 = vcmask (!%p341_p9), 1044480   ;;  %p379_p10 = scmp.lt.s32.totalorder (!%p341_p9), %s3154_s21, 1  ;;  %v3067_v1 = vmov (!%p341_p9), 65535   ;;  %v760_v36 = vlaneseq (!%p341_p9) }
  0x10   : > { %344 = sbr.rel (%p341_p9) target bundleno = 1333 (0x535), region = 64  ;;  %v562_v2 = vsel (!%p341_p9), %vm560_vm0, 4294967295, %v3067_v1  ;;  %vm511_vm2 = vcmask (!%p341_p9), 72704   ;;  %s4202_s0 = sld [smem:[#allocation7_spill]] (!%p341_p9)  ;;  %v2943_v21 = vld [vmem:[%s4183_s5] sm:$0xff] (!%p341_p9)   ;;  %v2944_v22 = vld [vmem:[%s4183_s5 + $0x8] sm:$0xff] (!%p341_p9)  }
  0x11   : > { %v563_v3 = vsel (!%p341_p9), %vm561_vm1, %v562_v2, 0  ;;  %v3232_v23 = vld [vmem:[%s4180_s2] ss:$0 sm:$0xff] (!%p341_p9)  ;;  %vm830_vm3 = vcmask (!%p341_p9), 261120   ;;  %v3243_v44 = vshrl.u32 (!%p341_p9), %v760_v36, 7  ;;  %s4190_s14 = smov (!%p341_p9), 64  }
  0x12   : > { %v565_v4 = vand.u32 (!%p341_p9), %v2926_v0, %v563_v3  ;;  %vm863_vm13 = vcmask (!%p341_p9), 523520   ;;  %vm896_vm14 = vcmask (!%p341_p9), 785920   ;;  %vm945_vm15 = vcmask (!%p341_p9), 1048320   ;;  %s4229_s24 = smov (!%p341_p9), 64   ;;  %s2599_s25 = sshll.u32 (!%p341_p9), %s3154_s21, 4 }
  0x13   : > { %v3249_v52 = vadd.s32 (!%p341_p9), 16, %v3243_v44  ;;  %v3252_v53 = vadd.s32 (!%p341_p9), 24, %v3243_v44  ;;  %v3257_v59 = vadd.s32 (!%p341_p9), 8, %v3243_v44  ;;  %v3265_v0 = vadd.s32 (!%p341_p9), 32, %v3243_v44 }
  0x14   : > { %2768 = vmatprep.subr.bf16.mxu0 (!%p341_p9), %v565_v4  ;;  %vm4192_vm4 = vcmp.lt.s32.totalorder (!%p341_p9), %v3243_v44, 1  ;;  %vm4193_vm0 = vcmp.lt.s32.totalorder (!%p341_p9), %v3243_v44, 7 }
  0x15   : > { %2769 = vmatpush3.bf16.msra.mxu0 (!%p341_p9), %v565_v4  ;;  %v796_v62 = vand.u32 (!%p341_p9), 7, %v3249_v52  ;;  %v797_v63 = vand.u32 (!%p341_p9), 7, %v3252_v53  ;;  %v2989_v53 = vld [vmem:[%s4185_s7 + $0x68] sm:$0xff] (!%p341_p9)  }
  0x16   : > { %2814 = vmatprep.subr.bf16.mxu0 (!%p341_p9), %v2943_v21 }
  0x17   : > { %s380_s12 = scalar_select %p379_p10, %s3154_s21, 1  ;;  %vm3280_vm5 = vcmp.ne.s32.totalorder %v796_v62, 0  ;;  %vm3286_vm6 = vcmp.ne.s32.totalorder %v797_v63, 0 }
  0x18   : > { %s3072_s21 = smov [#allocation4]  }
  0x19   : > { %s2602_s13 = sshll.u32 %s380_s12, 7  ;;  %s3069_s12 = smov 96  }
  0x1a   : > { %s3189_s16 = scalar_lea.vmem %s4202_s0, %s2602_s13  ;;  %s3068_s13 = smov 32  }
  0x1b   : > { %v2927_v5 = vld [vmem:[%s3189_s16] sm:$0xff]   ;;  %v2928_v6 = vld [vmem:[%s3189_s16 + $0x8] sm:$0xff]   ;;  %v2929_v7 = vld [vmem:[%s3189_s16 + $0x10] sm:$0xff]  }
  0x1c   : > { %2770 = vmatprep.mubr.msk.bf16.mxu0 %vm511_vm2, %v2927_v5  ;;  %v2930_v8 = vld [vmem:[%s3189_s16 + $0x18] sm:$0xff]   ;;  %v2931_v9 = vld [vmem:[%s3189_s16 + $0x20] sm:$0xff]   ;;  %v2932_v10 = vld [vmem:[%s3189_s16 + $0x28] sm:$0xff]  }
  0x1d   : > { %2771 = vmatmul.mubr.msk.bf16.vlgmr.msra.gmra.mrb[0].mxu0 %vm511_vm2, %v2928_v6  ;;  %v2933_v11 = vld [vmem:[%s3189_s16 + $0x30] sm:$0xff]   ;;  %v2934_v12 = vld [vmem:[%s3189_s16 + $0x38] sm:$0xff]   ;;  %v2935_v13 = vld [vmem:[%s3189_s16 + $0x40] sm:$0xff]  }
  0x1e   : > { %2774 = vmatprep.mubr.msk.bf16.mxu0 %vm511_vm2, %v2929_v7  ;;  %v2936_v14 = vld [vmem:[%s3189_s16 + $0x48] sm:$0xff]   ;;  %v2937_v15 = vld [vmem:[%s3189_s16 + $0x50] sm:$0xff]   ;;  %v2938_v16 = vld [vmem:[%s3189_s16 + $0x58] sm:$0xff]   ;;  %2815 = vmatpush3.bf16.msra.mxu0 %v2943_v21  ;;  %v795_v7 = vand.u32 7, %v3257_v59 }
  0x1f   : > { %v2939_v17 = vld [vmem:[%s3189_s16 + $0x60] sm:$0xff]   ;;  %v2940_v18 = vld [vmem:[%s3189_s16 + $0x68] sm:$0xff]   ;;  %v2941_v19 = vld [vmem:[%s3189_s16 + $0x70] sm:$0xff]   ;;  %2816 = vmatprep.subr.bf16.mxu0 %v2944_v22 }
  0x20   : > { %v2942_v20 = vld [vmem:[%s3189_s16 + $0x78] sm:$0xff]   ;;  %vm3324_vm8 = vcmp.ne.s32.totalorder %v795_v7, 0  ;;  %vm3667_vm1 = vcmp.ne.s32.totalorder %v795_v7, 7  ;;  %v2985_v59 = vld [vmem:[%s4185_s7 + $0x60] sm:$0xff]   ;;  %s4136_s16 = scalar_lea.hbm %s4189_s11, %s2599_s25 }
  0x21   : > { %v2986_v7 = vld [vmem:[%s4185_s7 + $0x20] sm:$0xff]  }
  0x22   : > { %2817 = vmatpush3.bf16.msra.mxu0 %v2944_v22  ;;  %v794_v22 = vand.u32 7, %v3243_v44 }
  0x24   : > { %vm3318_vm7 = vcmp.ne.s32.totalorder %v794_v22, 0 }
  0x25   : > { %2775 = vmatmul.mubr.msk.bf16.gmra.mrb[4].mxu0 %vm511_vm2, %v2930_v8  ;;  %v3273_v8 = vadd.s32 40, %v3243_v44 }
  0x26   : > { %2778 = vmatprep.mubr.msk.bf16.mxu0 %vm511_vm2, %v2931_v9  ;;  %v3276_v9 = vadd.s32 56, %v3243_v44 }
  0x2d   : > { %2779 = vmatmul.mubr.msk.bf16.gmra.mrb[8].mxu0 %vm511_vm2, %v2932_v10 }
  0x2e   : > { %2782 = vmatprep.mubr.msk.bf16.mxu0 %vm511_vm2, %v2933_v11 }
  0x35   : > { %2783 = vmatmul.mubr.msk.bf16.gmra.mrb[12].mxu0 %vm511_vm2, %v2934_v12 }
  0x36   : > { %2786 = vmatprep.mubr.msk.bf16.mxu0 %vm511_vm2, %v2935_v13  ;;  %v798_v13 = vand.u32 7, %v3265_v0 }
  0x38   : > { %vm3330_vm9 = vcmp.ne.s32.totalorder %v798_v13, 0 }
  0x3d   : > { %2787 = vmatmul.mubr.msk.bf16.gmra.mrb[16].mxu0 %vm511_vm2, %v2936_v14 }
  0x3e   : > { %2790 = vmatprep.mubr.msk.bf16.mxu0 %vm511_vm2, %v2937_v15 }
  0x45   : > { %2791 = vmatmul.mubr.msk.bf16.gmra.mrb[20].mxu0 %vm511_vm2, %v2938_v16 }
  0x46   : > { %2794 = vmatprep.mubr.msk.bf16.mxu0 %vm511_vm2, %v2939_v17  ;;  %v3292_v17 = vadd.s32 48, %v3243_v44 }
  0x4d   : > { %2795 = vmatmul.mubr.msk.bf16.gmra.mrb[24].mxu0 %vm511_vm2, %v2940_v18 }
  0x4e   : > { %2798 = vmatprep.mubr.msk.bf16.mxu0 %vm511_vm2, %v2941_v19 }
  0x55   : > { %2799 = vmatmul.mubr.msk.bf16.gmra.mrb[28].mxu0 %vm511_vm2, %v2942_v20  ;;  %vm4194_vm2 = vcmask 523264  }
  0xf0   : > { %v2772_v24 = vpop.f32.mrb[0].mxu0 }
  0xf1   : > { %v610_v25 = vadd.f32 %v2772_v24, %v3232_v23  ;;  %v601_v26 = vpop.f32.mrb[1].mxu0 }
  0xf2   : > { %v602_v27 = vadd.f32 %v3232_v23, %v601_v26  ;;  %v2773_v28 = vpop.f32.mrb[2].mxu0 }
  0xf3   : > { %v613_v29 = vadd.f32 %v2773_v28, %v3232_v23  ;;  %v604_v30 = vpop.f32.mrb[3].mxu0  ;;  %v730_v32 = vmax.f32 %v610_v25, 0.0  ;;  %v801_v28 = vand.u32 7, %v3276_v9 }
  0xf4   : > { %v605_v31 = vadd.f32 %v3232_v23, %v604_v30  ;;  %v728_v34 = vmax.f32 %v602_v27, 0.0  ;;  %v799_v27 = vand.u32 7, %v3273_v8 }
  0xf5   : > { %v731_v33 = vmax.f32 %v613_v29, 0.0  ;;  %vm3342_vm11 = vcmp.ne.s32.totalorder %v801_v28, 0 }
  0xf6   : > { %v729_v35 = vmax.f32 %v605_v31, 0.0  ;;  %vm3336_vm10 = vcmp.ne.s32.totalorder %v799_v27, 0 }
  0xf7   : > { %v951_v37 = vpack.c.bf16 %v731_v33, %v730_v32 }
  0xf8   : > { %v950_v38 = vpack.c.bf16 %v729_v35, %v728_v34  ;;  %v2776_v39 = vpop.f32.mrb[4].mxu0 }
  0xf9   : > { %v626_v40 = vadd.f32 %v2776_v39, %v3232_v23  ;;  %v617_v41 = vpop.f32.mrb[5].mxu0  ;;  %955 = vst.msk [vmem:[#allocation2 + $0x20] sm:$0xff] %vm830_vm3, %v951_v37 }
  0xfa   : > { %v618_v42 = vadd.f32 %v3232_v23, %v617_v41  ;;  %v2777_v43 = vpop.f32.mrb[6].mxu0  ;;  %2818 = vmatprep.mubr.msk.bf16.mxu0 %vm830_vm3, %v950_v38  ;;  %954 = vst.msk [vmem:[#allocation2 + $0x8] sm:$0xff] %vm830_vm3, %v950_v38  ;;  %v800_v38 = vand.u32 7, %v3292_v17  ;;  %v2992_v17 = vld [vmem:[%s4185_s7 + $0x70] sm:$0xff]  }
  0xfb   : > { %v629_v45 = vadd.f32 %v2777_v43, %v3232_v23  ;;  %v620_v46 = vpop.f32.mrb[7].mxu0  ;;  %2819 = vmatmul.mubr.msk.bf16.vlgmr.msra.gmra.mrb[32].mxu0 %vm830_vm3, %v951_v37  ;;  %v734_v48 = vmax.f32 %v626_v40, 0.0 }
  0xfc   : > { %v621_v47 = vadd.f32 %v3232_v23, %v620_v46  ;;  %v732_v50 = vmax.f32 %v618_v42, 0.0  ;;  %vm3353_vm12 = vcmp.ne.s32.totalorder %v800_v38, 0 }
  0xfd   : > { %v735_v49 = vmax.f32 %v629_v45, 0.0  ;;  %v4209_v45 = vmov 0 }
  0xfe   : > { %v733_v51 = vmax.f32 %v621_v47, 0.0  ;;  %v4210_v45 = vsel %vm3324_vm8, 4294967295, %v4209_v45 }
  0xff   : > { %v953_v54 = vpack.c.bf16 %v735_v49, %v734_v48 }
 0x100   : > { %v952_v55 = vpack.c.bf16 %v733_v51, %v732_v50  ;;  %v2780_v56 = vpop.f32.mrb[8].mxu0  ;;  %v2945_v51 = vld [vmem:[%s4181_s3 + $0x40] sm:$0xff]  }
 0x101   : > { %957 = vst.msk [vmem:[#allocation2 + $0x50] sm:$0xff] %vm830_vm3, %v953_v54  ;;  %v642_v57 = vadd.f32 %v2780_v56, %v3232_v23  ;;  %v633_v58 = vpop.f32.mrb[9].mxu0  ;;  %2620 = vmatprep.subr.bf16.mxu1 %v2945_v51 }
 0x102   : > { %956 = vst.msk [vmem:[#allocation2 + $0x38] sm:$0xff] %vm830_vm3, %v952_v55  ;;  %v634_v60 = vadd.f32 %v3232_v23, %v633_v58  ;;  %v2781_v61 = vpop.f32.mrb[10].mxu0  ;;  %2822 = vmatprep.mubr.msk.bf16.mxu0 %vm830_vm3, %v952_v55 }
 0x103   : > { %v738_v1 = vmax.f32 %v642_v57, 0.0  ;;  %v645_v2 = vadd.f32 %v2781_v61, %v3232_v23  ;;  %v636_v3 = vpop.f32.mrb[11].mxu0  ;;  %2823 = vmatmul.mubr.msk.bf16.gmra.mrb[36].mxu0 %vm830_vm3, %v953_v54 }
 0x104   : > { %v736_v4 = vmax.f32 %v634_v60, 0.0  ;;  %v637_v5 = vadd.f32 %v3232_v23, %v636_v3 }
 0x105   : > { %v739_v6 = vmax.f32 %v645_v2, 0.0  ;;  %v903_v14 = vrot.slane %v738_v1, 7 }
 0x106   : > { %v737_v10 = vmax.f32 %v637_v5, 0.0  ;;  %v901_v18 = vrot.slane %v736_v4, 7 }
 0x107   : > { %v904_v15 = vrot.slane %v739_v6, 7  ;;  %v959_v16 = vpack.c.bf16 %v739_v6, %v738_v1 }
 0x108   : > { %v902_v19 = vrot.slane %v737_v10, 7  ;;  %v958_v20 = vpack.c.bf16 %v737_v10, %v736_v4  ;;  %v2784_v21 = vpop.f32.mrb[12].mxu0 }
 0x109   : > { %v658_v24 = vadd.f32 %v2784_v21, %v3232_v23  ;;  %968 = vrot.lane.b32.xlu0 %v959_v16, %s3068_s13  ;;  %v649_v25 = vpop.f32.mrb[13].mxu0  ;;  %v913_v26 = vsel %vm4192_vm4, %v903_v14, %v904_v15 }
 0x10a   : > { %v650_v29 = vadd.f32 %v3232_v23, %v649_v25  ;;  %v2785_v30 = vpop.f32.mrb[14].mxu0  ;;  %v915_v31 = vsel %vm4192_vm4, %v901_v18, %v902_v19  ;;  %v914_v32 = vsel %vm4192_vm4, %v902_v19, %v903_v14  ;;  %v920_v33 = vsel %vm3286_vm6, %v913_v26, 0.0 }
 0x10b   : > { %v742_v34 = vmax.f32 %v658_v24, 0.0  ;;  %v661_v35 = vadd.f32 %v2785_v30, %v3232_v23  ;;  %v652_v36 = vpop.f32.mrb[15].mxu0  ;;  %v919_v37 = vsel %vm3280_vm5, %v914_v32, 0.0  ;;  %v918_v5 = vsel %vm3324_vm8, %v915_v31, 0.0 }
 0x10c   : > { %v740_v39 = vmax.f32 %v650_v29, 0.0  ;;  %v653_v40 = vadd.f32 %v3232_v23, %v652_v36  ;;  %v3313_v41 = vpack.c.bf16 %v920_v33, %v919_v37 }
 0x10d   : > { %v743_v42 = vmax.f32 %v661_v35, 0.0  ;;  %966 = vrot.lane.b32.xlu0 %v958_v20, %s3068_s13  ;;  %v907_v54 = vrot.slane %v742_v34, 7  ;;  %v2947_v20 = vld [vmem:[%s4181_s3 + $0x48] sm:$0xff]  }
 0x10e   : > { %v905_v47 = vrot.slane %v740_v39, 7  ;;  %v741_v48 = vmax.f32 %v653_v40, 0.0  ;;  %v3070_v40 = vmov 0.0  }
 0x10f   : > { %v908_v55 = vrot.slane %v743_v42, 7  ;;  %v3349_v56 = vpack.c.bf16 %v743_v42, %v742_v34  ;;  %v2948_v34 = vld [vmem:[%s4181_s3 + $0x8] sm:$0xff]  }
 0x110   : > { %v906_v58 = vrot.slane %v741_v48, 7  ;;  %v3357_v60 = vpack.c.bf16 %v741_v48, %v740_v39  ;;  %v2788_v61 = vpop.f32.mrb[16].mxu0  ;;  %v912_v1 = vsel %vm4192_vm4, %v904_v15, %v905_v47  ;;  %v2949_v39 = vld [vmem:[%s4181_s3 + $0x50] sm:$0xff]  }
 0x111   : > { %v674_v2 = vadd.f32 %v2788_v61, %v3232_v23  ;;  %v665_v3 = vpop.f32.mrb[17].mxu0  ;;  %v916_v4 = vsel %vm4192_vm4, %v908_v55, %v901_v18  ;;  %v909_v6 = vsel %vm4192_vm4, %v907_v54, %v908_v55  ;;  %v2946_v18 = vld [vmem:[%s4181_s3] sm:$0xff]   ;;  %v921_v26 = vsel %vm3330_vm9, %v912_v1, 0.0 }
 0x112   : > { %v666_v10 = vadd.f32 %v3232_v23, %v665_v3  ;;  %v2789_v14 = vpop.f32.mrb[18].mxu0  ;;  %v917_v16 = vsel %vm3318_vm7, %v916_v4, 0.0  ;;  %v911_v15 = vsel %vm4192_vm4, %v905_v47, %v906_v58  ;;  %v910_v19 = vsel %vm4192_vm4, %v906_v58, %v907_v54  ;;  %2621 = vmatpush3.bf16.msra.mxu1 %v2946_v18 }
 0x113   : > { %v677_v21 = vadd.f32 %v2789_v14, %v3232_v23  ;;  %v668_v24 = vpop.f32.mrb[19].mxu0  ;;  %v925_v25 = vpack.c.bf16 %v918_v5, %v917_v16  ;;  %v922_v29 = vsel %vm3336_vm10, %v911_v15, 0.0  ;;  %v923_v33 = vsel %vm3353_vm12, %v910_v19, 0.0  ;;  %2622 = vmatprep.subr.bf16.mxu1 %v2947_v20  ;;  %v2950_v14 = vld [vmem:[%s4181_s3 + $0x10] sm:$0xff]   ;;  %v2951_v16 = vld [vmem:[%s4181_s3 + $0x58] sm:$0xff]  }
 0x114   : > { %v744_v30 = vmax.f32 %v666_v10, 0.0  ;;  %v669_v31 = vadd.f32 %v3232_v23, %v668_v24  ;;  %v3387_v32 = vpack.c.bf16 %v922_v29, %v921_v26  ;;  %v746_v35 = vmax.f32 %v674_v2, 0.0  ;;  %v2952_v24 = vld [vmem:[%s4181_s3 + $0x18] sm:$0xff]  }
 0x115   : > { %v747_v36 = vmax.f32 %v677_v21, 0.0  ;;  %933 = vrot.lane.b32.xlu1 %v925_v25, %s3069_s12  ;;  %v924_v37 = vsel %vm3342_vm11, %v909_v6, 0.0 }
 0x116   : > { %v843_v42 = vpack.c.bf16 %v744_v30, %v3070_v40  ;;  %v745_v47 = vmax.f32 %v669_v31, 0.0  ;;  %v3401_v48 = vpack.c.bf16 %v924_v37, %v923_v33  ;;  %2623 = vmatpush3.bf16.msra.mxu1 %v2948_v34 }
 0x117   : > { %v1015_v51 = vpack.c.bf16 %v747_v36, %v746_v35  ;;  %2624 = vmatprep.subr.bf16.mxu1 %v2949_v39 }
 0x118   : > { %v844_v54 = vpack.c.bf16 %v746_v35, %v745_v47  ;;  %v1014_v55 = vpack.c.bf16 %v745_v47, %v744_v30  ;;  %v2792_v58 = vpop.f32.mrb[20].mxu0  ;;  %851 = vrot.lane.b32.xlu0 %v843_v42, %s3068_s13  ;;  %v2953_v35 = vld [vmem:[%s4181_s3 + $0x60] sm:$0xff]  }
 0x119   : > { %v690_v61 = vadd.f32 %v2792_v58, %v3232_v23  ;;  %v681_v1 = vpop.f32.mrb[21].mxu0 }
 0x11a   : > { %v682_v2 = vadd.f32 %v3232_v23, %v681_v1  ;;  %v2793_v3 = vpop.f32.mrb[22].mxu0  ;;  %853 = vrot.lane.b32.xlu1 %v844_v54, %s3068_s13  ;;  %2625 = vmatpush3.bf16.msra.mxu1 %v2950_v14  ;;  %v2956_v1 = vld [vmem:[%s4181_s3 + $0x28] sm:$0xff]  }
 0x11b   : > { %v693_v4 = vadd.f32 %v2793_v3, %v3232_v23  ;;  %v684_v5 = vpop.f32.mrb[23].mxu0  ;;  %v750_v15 = vmax.f32 %v690_v61, 0.0  ;;  %2626 = vmatprep.subr.bf16.mxu1 %v2951_v16 }
 0x11c   : > { %v748_v6 = vmax.f32 %v682_v2, 0.0  ;;  %v685_v10 = vadd.f32 %v3232_v23, %v684_v5  ;;  %1024 = vrot.lane.b32.xlu0 %v1015_v51, %s3069_s12 }
 0x11d   : > { %v751_v19 = vmax.f32 %v693_v4, 0.0 }
 0x11e   : > { %v3416_v18 = vpack.c.bf16 %v748_v6, %v747_v36  ;;  %v749_v20 = vmax.f32 %v685_v10, 0.0  ;;  %2627 = vmatpush3.bf16.msra.mxu1 %v2952_v24  ;;  %v2954_v36 = vld [vmem:[%s4181_s3 + $0x20] sm:$0xff]   ;;  %v2957_v24 = vld [vmem:[%s4181_s3 + $0x70] sm:$0xff]  }
 0x11f   : > { %v3418_v21 = vpack.c.bf16 %v751_v19, %v750_v15  ;;  %2628 = vmatprep.subr.bf16.mxu1 %v2953_v35  ;;  %v2958_v35 = vld [vmem:[%s4181_s3 + $0x30] sm:$0xff]  }
 0x120   : > { %v3423_v25 = vpack.c.bf16 %v750_v15, %v749_v20  ;;  %v3425_v26 = vpack.c.bf16 %v749_v20, %v748_v6  ;;  %v2796_v29 = vpop.f32.mrb[24].mxu0  ;;  %1022 = vrot.lane.b32.xlu0 %v1014_v55, %s3069_s12  ;;  %v2955_v55 = vld [vmem:[%s4181_s3 + $0x68] sm:$0xff]  }
 0x121   : > { %v706_v30 = vadd.f32 %v2796_v29, %v3232_v23  ;;  %v697_v31 = vpop.f32.mrb[25].mxu0 }
 0x122   : > { %v698_v33 = vadd.f32 %v3232_v23, %v697_v31  ;;  %v2797_v34 = vpop.f32.mrb[26].mxu0  ;;  %2629 = vmatpush3.bf16.msra.mxu1 %v2954_v36 }
 0x123   : > { %v754_v37 = vmax.f32 %v706_v30, 0.0  ;;  %v709_v39 = vadd.f32 %v2797_v34, %v3232_v23  ;;  %v700_v42 = vpop.f32.mrb[27].mxu0  ;;  %2630 = vmatprep.subr.bf16.mxu1 %v2955_v55 }
 0x124   : > { %v3437_v47 = vmax.f32 %v698_v33, 0.0  ;;  %v701_v51 = vadd.f32 %v3232_v23, %v700_v42 }
 0x125   : > { %v3440_v54 = vmax.f32 %v709_v39, 0.0  ;;  %v771_v2 = vrot.slane %v754_v37, 7 }
 0x126   : > { %v753_v58 = vmax.f32 %v701_v51, 0.0  ;;  %v876_v61 = vpack.c.bf16 %v3437_v47, %v3070_v40  ;;  %v769_v5 = vrot.slane %v3437_v47, 7  ;;  %2631 = vmatpush3.bf16.msra.mxu1 %v2956_v1 }
 0x127   : > { %v772_v3 = vrot.slane %v3440_v54, 7  ;;  %v1039_v4 = vpack.c.bf16 %v3440_v54, %v754_v37  ;;  %2632 = vmatprep.subr.bf16.mxu1 %v2957_v24 }
 0x128   : > { %v770_v6 = vrot.slane %v753_v58, 7  ;;  %v1038_v10 = vpack.c.bf16 %v753_v58, %v3437_v47  ;;  %v2800_v14 = vpop.f32.mrb[28].mxu0  ;;  %884 = vrot.lane.b32.xlu1 %v876_v61, %s4190_s14  ;;  %v877_v16 = vpack.c.bf16 %v754_v37, %v753_v58 }
 0x129   : > { %1043 = vst.msk [vmem:[#allocation2 + $0x28] sm:$0xff] %vm830_vm3, %v1039_v4  ;;  %v722_v15 = vadd.f32 %v2800_v14, %v3232_v23  ;;  %v713_v19 = vpop.f32.mrb[29].mxu0  ;;  %v782_v20 = vsel %vm4192_vm4, %v771_v2, %v772_v3  ;;  %v2959_v14 = vld [vmem:[%s4181_s3 + $0x78] sm:$0xff]  }
 0x12a   : > { %1042 = vst.msk [vmem:[#allocation2 + $0x10] sm:$0xff] %vm830_vm3, %v1038_v10  ;;  %v714_v29 = vadd.f32 %v3232_v23, %v713_v19  ;;  %v2801_v30 = vpop.f32.mrb[30].mxu0  ;;  %v783_v31 = vsel %vm4192_vm4, %v770_v6, %v771_v2  ;;  %v985_v33 = vsel %vm3286_vm6, %v782_v20, 0.0  ;;  %v784_v34 = vsel %vm4192_vm4, %v769_v5, %v770_v6  ;;  %2633 = vmatpush3.bf16.msra.mxu1 %v2958_v35 }
 0x12b   : > { %v3473_v36 = vmax.f32 %v722_v15, 0.0  ;;  %v725_v37 = vadd.f32 %v2801_v30, %v3232_v23  ;;  %v716_v39 = vpop.f32.mrb[31].mxu0  ;;  %v984_v42 = vsel %vm3280_vm5, %v783_v31, 0.0  ;;  %v820_v58 = vsel %vm3280_vm5, %v784_v34, 0.0  ;;  %2634 = vmatprep.subr.bf16.mxu1 %v2959_v14 }
 0x12c   : > { %v756_v47 = vmax.f32 %v714_v29, 0.0  ;;  %v717_v51 = vadd.f32 %v3232_v23, %v716_v39  ;;  %886 = vrot.lane.b32.xlu1 %v877_v16, %s4190_s14  ;;  %v991_v55 = vpack.c.bf16 %v985_v33, %v984_v42  ;;  %v983_v1 = vsel %vm3324_vm8, %v784_v34, 0.0  ;;  %v2960_v16 = vld [vmem:[%s4181_s3 + $0x38] sm:$0xff]   ;;  %v3525_v42 = vld [vmem:[%s4181_s3 + $0x80] sm:$0xff]  }
 0x12d   : > { %v759_v61 = vmax.f32 %v725_v37, 0.0  ;;  %v821_v2 = vsel %vm3286_vm6, %v783_v31, 0.0  ;;  %v775_v15 = vrot.slane %v3473_v36, 7  ;;  %v822_v29 = vsel %vm3330_vm9, %v782_v20, 0.0 }
 0x12e   : > { %v773_v4 = vrot.slane %v756_v47, 7  ;;  %v757_v6 = vmax.f32 %v717_v51, 0.0  ;;  %1000 = vrot.lane.b32.xlu0 %v991_v55, %s4190_s14  ;;  %v878_v10 = vpack.c.bf16 %v756_v47, %v3440_v54  ;;  %v827_v23 = vpack.c.bf16 %v821_v2, %v820_v58  ;;  %2635 = vmatpush3.bf16.msra.mxu1 %v2960_v16 }
 0x12f   : > { %v776_v19 = vrot.slane %v759_v61, 7  ;;  %v1041_v24 = vpack.c.bf16 %v759_v61, %v3473_v36  ;;  %2802 = vmatprep.subr.bf16.mxu1 %v3525_v42 }
 0x130   : > { %v774_v30 = vrot.slane %v757_v6, 7  ;;  %v1040_v54 = vpack.c.bf16 %v757_v6, %v756_v47  ;;  %v781_v31 = vsel %vm4192_vm4, %v772_v3, %v773_v4  ;;  %v879_v33 = vpack.c.bf16 %v3473_v36, %v757_v6  ;;  %832 = vst.msk [vmem:[#allocation2 + $0x18] sm:$0xff] %vm830_vm3, %v827_v23 }
 0x131   : > { %1045 = vst.msk [vmem:[#allocation2 + $0x58] sm:$0xff] %vm830_vm3, %v1041_v24  ;;  %v785_v34 = vsel %vm4192_vm4, %v776_v19, %v769_v5  ;;  %v986_v35 = vsel %vm3330_vm9, %v781_v31, 0.0  ;;  %v778_v20 = vsel %vm4192_vm4, %v775_v15, %v776_v19  ;;  %v823_v37 = vsel %vm3336_vm10, %v781_v31, 0.0 }
 0x132   : > { %1044 = vst.msk [vmem:[#allocation2 + $0x40] sm:$0xff] %vm830_vm3, %v1040_v54  ;;  %970 = vrot.lane.b32.xlu0 %v3357_v60, %s3068_s13  ;;  %v982_v3 = vsel %vm3318_vm7, %v785_v34, 0.0  ;;  %v780_v5 = vsel %vm4192_vm4, %v773_v4, %v774_v30  ;;  %v779_v36 = vsel %vm4192_vm4, %v774_v30, %v775_v15  ;;  %v989_v39 = vsel %vm3342_vm11, %v778_v20, 0.0 }
 0x133   : > { %v990_v47 = vpack.c.bf16 %v983_v1, %v982_v3  ;;  %v987_v60 = vsel %vm3336_vm10, %v780_v5, 0.0  ;;  %v988_v51 = vsel %vm3353_vm12, %v779_v36, 0.0  ;;  %v819_v55 = vsel %vm3324_vm8, %v785_v34, 0.0 }
 0x134   : > { %v992_v58 = vpack.c.bf16 %v987_v60, %v986_v35  ;;  %v993_v61 = vpack.c.bf16 %v989_v39, %v988_v51  ;;  %v826_v2 = vpack.c.bf16 %v819_v55, %v3070_v40  ;;  %v828_v4 = vpack.c.bf16 %v823_v37, %v822_v29 }
 0x135   : > { %998 = vrot.lane.b32.xlu1 %v990_v47, %s4190_s14  ;;  %v824_v1 = vsel %vm3353_vm12, %v780_v5, 0.0  ;;  %v825_v6 = vsel %vm3342_vm11, %v779_v36, 0.0 }
 0x136   : > { %1026 = vrot.lane.b32.xlu0 %v3425_v26, %s3069_s12  ;;  %831 = vst.msk [vmem:[#allocation2] sm:$0xff] %vm830_vm3, %v826_v2  ;;  %833 = vst.msk [vmem:[#allocation2 + $0x30] sm:$0xff] %vm830_vm3, %v828_v4  ;;  %v829_v23 = vpack.c.bf16 %v825_v6, %v824_v1  ;;  %v1051_v2 = vld [vmem:[#allocation2 + $0x28] sm:$0xff]  ;;  %v2963_v6 = vld [vmem:[%s4185_s7 + $0xc0] sm:$0xff]  }
 0x137   : > { %2712 = vmatprep.subr.bf16.mxu0 %v2963_v6  ;;  %v2520_v6 = vld [vmem:[%s4182_s4] ss:$0 sm:$0xff] }
 0x138   : > { %834 = vst.msk [vmem:[#allocation2 + $0x48] sm:$0xff] %vm830_vm3, %v829_v23  ;;  %v1057_v1 = vld [vmem:[#allocation2 + $0x58] sm:$0xff]  ;;  %v2964_v23 = vld [vmem:[%s4185_s7 + $0x80] sm:$0xff]  }
 0x139   : > { %935 = vrot.lane.b32.xlu1 %v3313_v41, %s3069_s12  ;;  %v1054_v4 = vld [vmem:[#allocation2 + $0x40] sm:$0xff]  ;;  %2713 = vmatpush3.bf16.msra.mxu0 %v2964_v23  ;;  %v2978_v23 = vld [vmem:[%s4185_s7 + $0x10] sm:$0xff]  }
 0x13a   : > { %1002 = vrot.lane.b32.xlu0 %v992_v58, %s4190_s14 }
 0x13d   : > { %855 = vrot.lane.b32.xlu1 %v3416_v18, %s3068_s13 }
 0x13e   : > { %972 = vrot.lane.b32.xlu0 %v3349_v56, %s3068_s13 }
 0x141   : > { %888 = vrot.lane.b32.xlu1 %v878_v10, %s4190_s14 }
 0x142   : > { %1004 = vrot.lane.b32.xlu0 %v993_v61, %s4190_s14  ;;  %v1048_v61 = vld [vmem:[#allocation2 + $0x10] sm:$0xff] }
 0x145   : > { %937 = vrot.lane.b32.xlu1 %v3387_v32, %s3069_s12 }
 0x146   : > { %1028 = vrot.lane.b32.xlu0 %v3418_v21, %s3069_s12 }
 0x149   : > { %857 = vrot.lane.b32.xlu1 %v3423_v25, %s3068_s13  ;;  %s377_s13 = sand.u32 1, %s3057_s18  }
 0x14a   : > { %s2413_s22 = scalar_lea.sflag [#allocation5], %s377_s13 }
 0x14d   : > { %890 = vrot.lane.b32.xlu1 %v879_v33, %s4190_s14  ;;  %v2962_v33 = vld [vmem:[%s4181_s3 + $0x88] sm:$0xff]  }
 0x151   : > { %939 = vrot.lane.b32.xlu1 %v3401_v48, %s3069_s12  ;;  %s3007_s12 = sshll.u32 %s3072_s21, 4  ;;  %s3008_s12 = int_to_ptr.vmem [resolvable:$false] %s3007_s12 }
 0x152   : > { %s3009_s0 = scalar_lea.vmem %s3008_s12, 32 }
 0x17b   : > { %v969_v41 = vpop.permute.xlu0 %968 }
 0x17c   : > { %979 = vst.msk [vmem:[#allocation2 + $0x20] sm:$0xff] %vm863_vm13, %v969_v41  ;;  %v2965_v41 = vld [vmem:[%s4185_s7 + $0xc8] sm:$0xff]  }
 0x17d   : > { %2714 = vmatprep.subr.bf16.mxu0 %v2965_v41  ;;  %v2979_v41 = vld [vmem:[%s4185_s7 + $0xe8] sm:$0xff]  }
 0x17f   : > { %v967_v56 = vpop.permute.xlu0 %966 }
 0x180   : > { %978 = vst.msk [vmem:[#allocation2 + $0x8] sm:$0xff] %vm863_vm13, %v967_v56  ;;  %v2969_v56 = vld [vmem:[%s4185_s7 + $0x40] sm:$0xff]  }
 0x187   : > { %v934_v18 = vpop.permute.xlu1 %933 }
 0x18a   : > { %v852_v32 = vpop.permute.xlu0 %851 }
 0x18b   : > { %864 = vst.msk [vmem:[#allocation2] sm:$0xff] %vm863_vm13, %v852_v32  ;;  %v2966_v32 = vld [vmem:[%s4185_s7 + $0x88] sm:$0xff]  }
 0x18c   : > { %v854_v21 = vpop.permute.xlu1 %853  ;;  %2715 = vmatpush3.bf16.msra.mxu0 %v2966_v32 }
 0x18d   : > { %865 = vst.msk [vmem:[#allocation2 + $0x18] sm:$0xff] %vm863_vm13, %v854_v21  ;;  %v2973_v21 = vld [vmem:[%s4185_s7 + $0x48] sm:$0xff]  }
 0x18e   : > { %v1025_v25 = vpop.permute.xlu0 %1024 }
 0x192   : > { %v1023_v48 = vpop.permute.xlu0 %1022 }
 0x19a   : > { %v885_v26 = vpop.permute.xlu1 %884 }
 0x19b   : > { %897 = vst.msk [vmem:[#allocation2] sm:$0xff] %vm896_vm14, %v885_v26  ;;  %v2974_v26 = vld [vmem:[%s4185_s7 + $0x8] sm:$0xff]  }
 0x19c   : > { %946 = vst.msk [vmem:[#allocation2] sm:$0xff] %vm945_vm15, %v934_v18  ;;  %v2970_v18 = vld [vmem:[%s4185_s7] sm:$0xff]  }
 0x19e   : > { %v887_v10 = vpop.permute.xlu1 %886 }
 0x19f   : > { %898 = vst.msk [vmem:[#allocation2 + $0x18] sm:$0xff] %vm896_vm14, %v887_v10  ;;  %v2968_v10 = vld [vmem:[%s4185_s7 + $0x90] sm:$0xff]  }
 0x1a0   : > { %v1001_v14 = vpop.permute.xlu0 %1000 }
 0x1a1   : > { %1011 = vst.msk [vmem:[#allocation2 + $0x20] sm:$0xff] %vm896_vm14, %v1001_v14  ;;  %v2971_v14 = vld [vmem:[%s4185_s7 + $0xd8] sm:$0xff]  }
 0x1a2   : > { %1035 = vst.msk [vmem:[#allocation2 + $0x20] sm:$0xff] %vm945_vm15, %v1025_v25  ;;  %v2967_v25 = vld [vmem:[%s4185_s7 + $0xd0] sm:$0xff]  }
 0x1a3   : > { %v1046_v34 = vld [vmem:[#allocation2] sm:$0xff]  ;;  %2716 = vmatprep.subr.bf16.mxu0 %v2967_v25 }
 0x1a4   : > { %v971_v16 = vpop.permute.xlu0 %970  ;;  %2717 = vmatpush3.bf16.msra.mxu0 %v2968_v10 }
 0x1a5   : > { %980 = vst.msk [vmem:[#allocation2 + $0x38] sm:$0xff] %vm863_vm13, %v971_v16  ;;  %v2972_v16 = vld [vmem:[%s4185_s7 + $0x98] sm:$0xff]   ;;  %2718 = vmatprep.subr.bf16.mxu0 %v2971_v14 }
 0x1a6   : > { %v2982_v14 = vld [vmem:[%s4185_s7 + $0x18] sm:$0xff]  }
 0x1a7   : > { %v999_v15 = vpop.permute.xlu1 %998 }
 0x1a8   : > { %1010 = vst.msk [vmem:[#allocation2 + $0x8] sm:$0xff] %vm896_vm14, %v999_v15  ;;  %v1027_v19 = vpop.permute.xlu0 %1026  ;;  %v2975_v15 = vld [vmem:[%s4185_s7 + $0xe0] sm:$0xff]   ;;  %2719 = vmatpush3.bf16.msra.mxu0 %v2972_v16  ;;  %v2983_v16 = vld [vmem:[%s4185_s7 + $0xf0] sm:$0xff]  }
 0x1a9   : > { %1034 = vst.msk [vmem:[#allocation2 + $0x8] sm:$0xff] %vm945_vm15, %v1023_v48  ;;  %v1050_v35 = vld [vmem:[#allocation2 + $0x20] sm:$0xff]  ;;  %v2977_v48 = vld [vmem:[%s4185_s7 + $0x50] sm:$0xff]   ;;  %2720 = vmatprep.subr.bf16.mxu0 %v2975_v15 }
 0x1aa   : > { %v2984_v15 = vld [vmem:[%s4185_s7 + $0xb0] sm:$0xff]  }
 0x1ab   : > { %v936_v24 = vpop.permute.xlu1 %935 }
 0x1ac   : > { %947 = vst.msk [vmem:[#allocation2 + $0x18] sm:$0xff] %vm945_vm15, %v936_v24  ;;  %v1003_v29 = vpop.permute.xlu0 %1002 }
 0x1ad   : > { %1012 = vst.msk [vmem:[#allocation2 + $0x38] sm:$0xff] %vm896_vm14, %v1003_v29 }
 0x1ae   : > { %1036 = vst.msk [vmem:[#allocation2 + $0x38] sm:$0xff] %vm945_vm15, %v1027_v19  ;;  %v2976_v19 = vld [vmem:[%s4185_s7 + $0xa0] sm:$0xff]  }
 0x1af   : > { %v856_v30 = vpop.permute.xlu1 %855  ;;  %2721 = vmatpush3.bf16.msra.mxu0 %v2976_v19 }
 0x1b0   : > { %866 = vst.msk [vmem:[#allocation2 + $0x30] sm:$0xff] %vm863_vm13, %v856_v30  ;;  %v973_v54 = vpop.permute.xlu0 %972  ;;  %v1047_v31 = vld [vmem:[#allocation2 + $0x8] sm:$0xff]  ;;  %2722 = vmatprep.subr.bf16.mxu0 %v2979_v41 }
 0x1b1   : > { %981 = vst.msk [vmem:[#allocation2 + $0x50] sm:$0xff] %vm863_vm13, %v973_v54  ;;  %1253 = vmatprep.mubr.bf16.mxu1 %v1047_v31 }
 0x1b2   : > { %1254 = vmatmul.mubr.bf16.vlgmr.msra.gmra.mrb[0].mxu1 %v1046_v34 }
 0x1b3   : > { %v889_v20 = vpop.permute.xlu1 %888  ;;  %1261 = vmatprep.mubr.bf16.mxu1 %v1050_v35  ;;  %2803 = vmatpush3.bf16.msra.mxu1 %v3525_v42  ;;  %v1049_v36 = vld [vmem:[#allocation2 + $0x18] sm:$0xff] }
 0x1b4   : > { %899 = vst.msk [vmem:[#allocation2 + $0x30] sm:$0xff] %vm896_vm14, %v889_v20  ;;  %v1005_v37 = vpop.permute.xlu0 %1004  ;;  %2804 = vmatprep.subr.bf16.mxu1 %v2962_v33 }
 0x1b5   : > { %1013 = vst.msk [vmem:[#allocation2 + $0x50] sm:$0xff] %vm896_vm14, %v1005_v37  ;;  %v1053_v39 = vld [vmem:[#allocation2 + $0x38] sm:$0xff] }
 0x1b7   : > { %v938_v3 = vpop.permute.xlu1 %937  ;;  %2805 = vmatpush3.bf16.msra.mxu1 %v2962_v33 }
 0x1b8   : > { %948 = vst.msk [vmem:[#allocation2 + $0x30] sm:$0xff] %vm945_vm15, %v938_v3  ;;  %v1029_v5 = vpop.permute.xlu0 %1028  ;;  %2672 = vmatprep.subr.bf16.mxu1 %v2969_v56  ;;  %v2980_v56 = vld [vmem:[%s4185_s7 + $0xa8] sm:$0xff]  }
 0x1b9   : > { %1037 = vst.msk [vmem:[#allocation2 + $0x50] sm:$0xff] %vm945_vm15, %v1029_v5  ;;  %2723 = vmatpush3.bf16.msra.mxu0 %v2980_v56 }
 0x1ba   : > { %1262 = vmatmul.mubr.bf16.gmra.mrb[4].mxu1 %v1049_v36  ;;  %2724 = vmatprep.subr.bf16.mxu0 %v2983_v16 }
 0x1bb   : > { %v858_v47 = vpop.permute.xlu1 %857  ;;  %1269 = vmatprep.mubr.bf16.mxu1 %v1053_v39 }
 0x1bc   : > { %867 = vst.msk [vmem:[#allocation2 + $0x48] sm:$0xff] %vm863_vm13, %v858_v47  ;;  %vm3692_vm13 = vcmp.ne.s32.totalorder %v794_v22, 7 }
 0x1bd   : > { %2725 = vmatpush3.bf16.msra.mxu0 %v2984_v15 }
 0x1bf   : > { %v891_v42 = vpop.permute.xlu1 %890  ;;  %v1052_v60 = vld [vmem:[#allocation2 + $0x30] sm:$0xff] }
 0x1c0   : > { %900 = vst.msk [vmem:[#allocation2 + $0x48] sm:$0xff] %vm896_vm14, %v891_v42  ;;  %v1056_v51 = vld [vmem:[#allocation2 + $0x50] sm:$0xff]  ;;  %vm3718_vm14 = vcmp.ne.s32.totalorder %v797_v63, 7  ;;  %v2990_v63 = vld [vmem:[%s4185_s7 + $0x28] sm:$0xff]  }
 0x1c2   : > { %1270 = vmatmul.mubr.bf16.gmra.mrb[8].mxu1 %v1052_v60 }
 0x1c3   : > { %v940_v55 = vpop.permute.xlu1 %939  ;;  %1277 = vmatprep.mubr.bf16.mxu1 %v1056_v51 }
 0x1c4   : > { %949 = vst.msk [vmem:[#allocation2 + $0x48] sm:$0xff] %vm945_vm15, %v940_v55  ;;  %vm3728_vm15 = vcmp.ne.s32.totalorder %v799_v27, 7 }
 0x1cb   : > { %v1055_v58 = vld [vmem:[#allocation2 + $0x48] sm:$0xff] }
 0x1cc   : > { %1278 = vmatmul.mubr.bf16.gmra.mrb[12].mxu1 %v1055_v58 }
 0x1cd   : > { %2806 = vmatprep.mubr.msk.bf16.mxu1 %vm830_vm3, %v1048_v61 }
 0x1d4   : > { %2807 = vmatmul.mubr.msk.bf16.vlgmr.msra.gmra.mrb[16].mxu1 %vm830_vm3, %v1051_v2 }
 0x1d5   : > { %2810 = vmatprep.mubr.msk.bf16.mxu1 %vm830_vm3, %v1054_v4  ;;  %2673 = vmatpush3.bf16.msra.mxu1 %v2970_v18  ;;  %v2981_v18 = vld [vmem:[%s4185_s7 + $0x58] sm:$0xff]  }
 0x1d6   : > { %2674 = vmatprep.subr.bf16.mxu1 %v2973_v21 }
 0x1d9   : > { %2675 = vmatpush3.bf16.msra.mxu1 %v2974_v26 }
 0x1da   : > { %2676 = vmatprep.subr.bf16.mxu1 %v2977_v48 }
 0x1dc   : > { %2811 = vmatmul.mubr.msk.bf16.gmra.mrb[20].mxu1 %vm830_vm3, %v1057_v1  ;;  %vm3675_vm3 = vcmp.ne.s32.totalorder %v796_v62, 7 }
 0x1dd   : > { %2677 = vmatpush3.bf16.msra.mxu1 %v2978_v23 }
 0x1de   : > { %2678 = vmatprep.subr.bf16.mxu1 %v2981_v18 }
 0x1e1   : > { %2679 = vmatpush3.bf16.msra.mxu1 %v2982_v14 }
 0x1e2   : > { %2680 = vmatprep.subr.bf16.mxu1 %v2985_v59 }
 0x1e5   : > { %2681 = vmatpush3.bf16.msra.mxu1 %v2986_v7 }
 0x1e6   : > { %2682 = vmatprep.subr.bf16.mxu1 %v2989_v53 }
 0x1e9   : > { %2683 = vmatpush3.bf16.msra.mxu1 %v2990_v63 }
 0x1ea   : > { %2684 = vmatprep.subr.bf16.mxu1 %v2992_v17 }
 0x285   : > { %v2636_v24 = vpop.f32.mrb[0].mxu1 }
 0x286   : > { %v2637_v29 = vpop.f32.mrb[1].mxu1 }
 0x287   : > { %v2638_v30 = vadd.f32 %v2637_v29, %v2636_v24  ;;  %v2639_v54 = vpop.f32.mrb[2].mxu1 }
 0x288   : > { %v2640_v31 = vpop.f32.mrb[3].mxu1 }
 0x289   : > { %v2641_v33 = vadd.f32 %v2640_v31, %v2639_v54  ;;  %v1256_v25 = vadd.f32 %v2638_v30, %v2520_v6  ;;  %v4219_v30 = vmov 0 }
 0x28a   : > { %v4220_v30 = vsel %vm3667_vm1, 4294967295, %v4219_v30 }
 0x28b   : > { %v1259_v29 = vadd.f32 %v2641_v33, %v2520_v6  ;;  %v2987_v33 = vld [vmem:[%s4185_s7 + $0xf8] sm:$0xff]  }
 0x28c   : > { %2726 = vmatprep.subr.bf16.mxu0 %v2987_v33 }
 0x28d   : > { %v2642_v34 = vpop.f32.mrb[4].mxu1 }
 0x28e   : > { %v2643_v35 = vpop.f32.mrb[5].mxu1 }
 0x28f   : > { %v2644_v20 = vadd.f32 %v2643_v35, %v2642_v34  ;;  %v2645_v37 = vpop.f32.mrb[6].mxu1 }
 0x290   : > { %v2646_v3 = vpop.f32.mrb[7].mxu1 }
 0x291   : > { %v2647_v5 = vadd.f32 %v2646_v3, %v2645_v37  ;;  %v1264_v32 = vadd.f32 %v2644_v20, %v2520_v6 }
 0x293   : > { %v1267_v10 = vadd.f32 %v2647_v5, %v2520_v6 }
 0x295   : > { %v2648_v36 = vpop.f32.mrb[8].mxu1 }
 0x296   : > { %v2649_v39 = vpop.f32.mrb[9].mxu1 }
 0x297   : > { %v2650_v47 = vadd.f32 %v2649_v39, %v2648_v36  ;;  %v2651_v42 = vpop.f32.mrb[10].mxu1 }
 0x298   : > { %v2652_v60 = vpop.f32.mrb[11].mxu1 }
 0x299   : > { %v2653_v51 = vadd.f32 %v2652_v60, %v2651_v42  ;;  %v1272_v62 = vadd.f32 %v2650_v47, %v2520_v6  ;;  %v2988_v42 = vld [vmem:[%s4185_s7 + $0xb8] sm:$0xff]  }
 0x29a   : > { %2727 = vmatpush3.bf16.msra.mxu0 %v2988_v42 }
 0x29b   : > { %v1275_v39 = vadd.f32 %v2653_v51, %v2520_v6 }
 0x29f   : > { %v2654_v55 = vpop.f32.mrb[12].mxu1 }
 0x2a0   : > { %v2655_v58 = vpop.f32.mrb[13].mxu1 }
 0x2a1   : > { %v2656_v61 = vadd.f32 %v2655_v58, %v2654_v55  ;;  %v2657_v2 = vpop.f32.mrb[14].mxu1 }
 0x2a2   : > { %v2658_v4 = vpop.f32.mrb[15].mxu1 }
 0x2a3   : > { %v2659_v1 = vadd.f32 %v2658_v4, %v2657_v2  ;;  %v1280_v5 = vadd.f32 %v2656_v61, %v2520_v6 }
 0x2a5   : > { %v1283_v36 = vadd.f32 %v2659_v1, %v2520_v6 }
 0x2a7   : > { %v2808_v21 = vpop.f32.mrb[16].mxu1 }
 0x2a8   : > { %v1329_v26 = vadd.f32 %v2808_v21, %v1264_v32  ;;  %v1320_v48 = vpop.f32.mrb[17].mxu1 }
 0x2a9   : > { %v1321_v19 = vadd.f32 %v1320_v48, %v1256_v25  ;;  %v2809_v24 = vpop.f32.mrb[18].mxu1 }
 0x2aa   : > { %v3671_v54 = vmax.f32 %v1329_v26, 0.0  ;;  %v1332_v31 = vadd.f32 %v2809_v24, %v1267_v10  ;;  %v1323_v34 = vpop.f32.mrb[19].mxu1  ;;  %v3759_v26 = vld [vmem:[%s4185_s7 + $0x100] sm:$0xff]  }
 0x2ab   : > { %v3688_v20 = vmax.f32 %v1321_v19, 0.0  ;;  %v1324_v52 = vadd.f32 %v1323_v34, %v1259_v29  ;;  %2826 = vmatprep.subr.bf16.mxu0 %v3759_v26 }
 0x2ac   : > { %v3696_v3 = vmax.f32 %v1332_v31, 0.0  ;;  %v1461_v47 = vrot.slane %v3671_v54, 7  ;;  %v1527_v60 = vrot.slane %v3671_v54, 1 }
 0x2ad   : > { %v1459_v22 = vrot.slane %v3688_v20, 7  ;;  %v3704_v55 = vmax.f32 %v1324_v52, 0.0  ;;  %v1525_v58 = vrot.slane %v3688_v20, 1  ;;  %v3724_v41 = vpack.c.bf16 %v3688_v20, %v3070_v40 }
 0x2ae   : > { %v1462_v61 = vrot.slane %v3696_v3, 7  ;;  %v1528_v51 = vrot.slane %v3696_v3, 1  ;;  %v1607_v2 = vpack.c.bf16 %v3696_v3, %v3671_v54 }
 0x2af   : > { %v1526_v4 = vrot.slane %v3704_v55, 1  ;;  %v2812_v1 = vpop.f32.mrb[20].mxu1  ;;  %v3714_v6 = vpack.c.bf16 %v3671_v54, %v3704_v55  ;;  %v1606_v18 = vpack.c.bf16 %v3704_v55, %v3688_v20  ;;  %v1460_v32 = vrot.slane %v3704_v55, 7 }
 0x2b0   : > { %v1345_v21 = vadd.f32 %v2812_v1, %v1280_v5  ;;  %v1336_v8 = vpop.f32.mrb[21].mxu1  ;;  %v3745_v27 = vsel %vm4193_vm0, %v1527_v60, %v1528_v51  ;;  %v3753_v25 = vsel %vm4192_vm4, %v1461_v47, %v1462_v61  ;;  %1611 = vst.msk [vmem:[#allocation3 + $0x38] sm:$0xff] %vm4194_vm2, %v1607_v2  ;;  %vm3778_vm4 = vcmp.ne.s32.totalorder %v798_v13, 7 }
 0x2b1   : > { %v1337_v48 = vadd.f32 %v1336_v8, %v1272_v62  ;;  %v2813_v10 = vpop.f32.mrb[22].mxu1  ;;  %1694 = vrot.lane.b32.xlu0 %v3714_v6, %s4229_s24  ;;  %v3765_v14 = vsel %vm4193_vm0, %v1526_v4, %v1527_v60  ;;  %v3771_v16 = vsel %vm4193_vm0, %v1525_v58, %v1526_v4  ;;  %v1616_v15 = vsel %vm3675_vm3, %v3745_v27, 0.0  ;;  %1610 = vst.msk [vmem:[#allocation3 + $0x10] sm:$0xff] %vm4194_vm2, %v1606_v18 }
 0x2b2   : > { %v3783_v24 = vmax.f32 %v1345_v21, 0.0  ;;  %v1348_v29 = vadd.f32 %v2813_v10, %v1283_v36  ;;  %v1339_v31 = vpop.f32.mrb[23].mxu1  ;;  %v1614_v34 = vsel %vm3692_vm13, %v3771_v16, 0.0  ;;  %v1615_v59 = vsel %vm3667_vm1, %v3765_v14, 0.0  ;;  %v2995_v10 = vld [vmem:[%s4185_s7 + $0x38] sm:$0xff]  }
 0x2b3   : > { %vm3793_vm0 = vcmp.ne.s32.totalorder %v800_v38, 7  ;;  %v3798_v13 = vmax.f32 %v1337_v48, 0.0  ;;  %v1340_v7 = vadd.f32 %v1339_v31, %v1275_v39  ;;  %v1622_v33 = vpack.c.bf16 %v1615_v59, %v1614_v34  ;;  %v2993_v38 = vld [vmem:[%s4185_s7 + $0x30] sm:$0xff]   ;;  %v2994_v48 = vld [vmem:[%s4185_s7 + $0x78] sm:$0xff]  }
 0x2b4   : > { %v1718_v52 = vsel %vm3692_vm13, %v3765_v14, 0.0  ;;  %vm3805_vm2 = vcmp.ne.s32.totalorder %v801_v28, 7  ;;  %v4234_v62 = vmov 0  ;;  %v1465_v5 = vrot.slane %v3783_v24, 7  ;;  %2685 = vmatpush3.bf16.msra.mxu1 %v2993_v38 }
 0x2b5   : > { %v4235_v62 = vsel %vm3805_vm2, 4294967295, %v4234_v62  ;;  %v1531_v36 = vrot.slane %v3783_v24, 1  ;;  %v3817_v37 = vmax.f32 %v1348_v29, 0.0  ;;  %v1719_v9 = vsel %vm3667_vm1, %v3745_v27, 0.0  ;;  %1630 = vrot.lane.b32.xlu1 %v1622_v33, %s4229_s24  ;;  %2686 = vmatprep.subr.bf16.mxu1 %v2994_v48 }
 0x2b6   : > { %v1463_v28 = vrot.slane %v3798_v13, 7  ;;  %v1529_v39 = vrot.slane %v3798_v13, 1  ;;  %v3824_v42 = vmax.f32 %v1340_v7, 0.0  ;;  %v3829_v60 = vpack.c.bf16 %v3798_v13, %v3696_v3 }
 0x2b7   : > { %v1466_v2 = vrot.slane %v3817_v37, 7  ;;  %v1532_v4 = vrot.slane %v3817_v37, 1  ;;  %v1726_v1 = vpack.c.bf16 %v1719_v9, %v1718_v52  ;;  %vm4236_vm13 = vcmp.lt.s32.totalorder %v3243_v44, 1 }
 0x2b8   : > { %v3839_v18 = vsel %vm4236_vm13, %v1459_v22, %v1460_v32  ;;  %v1464_v53 = vrot.slane %v3824_v42, 7  ;;  %v1530_v63 = vrot.slane %v3824_v42, 1  ;;  %1696 = vrot.lane.b32.xlu0 %v3829_v60, %s4229_s24  ;;  %vm4237_vm1 = vcmp.lt.s32.totalorder %v3243_v44, 7  ;;  %2687 = vmatpush3.bf16.msra.mxu1 %v2995_v10 }
 0x2b9   : > { %v3849_v21 = vsel %vm4237_vm1, %v1528_v51, %v1529_v39  ;;  %v1575_v8 = vsel %vm3324_vm8, %v3839_v18, 0.0  ;;  %vm4238_vm1 = vcmask 523264   ;;  %v3871_v31 = vsel %vm4236_vm13, %v1466_v2, %v1459_v22 }
 0x2ba   : > { %v1617_v29 = vsel %vm3718_vm14, %v3849_v21, 0.0  ;;  %v1720_v51 = vsel %vm3675_vm3, %v3849_v21, 0.0  ;;  %1730 = vst.msk [vmem:[#allocation3 + $0x20] sm:$0xff] %vm4238_vm1, %v1726_v1  ;;  %v3875_v34 = vpack.c.bf16 %v3783_v24, %v3824_v42  ;;  %v1574_v7 = vsel %vm3318_vm7, %v3871_v31, 0.0 }
 0x2bb   : > { %v1623_v59 = vpack.c.bf16 %v1617_v29, %v1616_v15  ;;  %vm4239_vm8 = vcmp.lt.s32.totalorder %v3243_v44, 7  ;;  %v1582_v22 = vpack.c.bf16 %v1575_v8, %v1574_v7  ;;  %v1577_v48 = vsel %vm3286_vm6, %v3753_v25, 0.0 }
 0x2bc   : > { %v3882_v33 = vsel %vm4239_vm8, %v1530_v63, %v1531_v36  ;;  %vm4240_vm1 = vmmov %vm4239_vm8  ;;  %v1689_v10 = vpack.c.bf16 %v3070_v40, %v3817_v37  ;;  %v1477_v23 = vsel %vm3280_vm5, %v3839_v18, 0.0  ;;  %v1479_v56 = vsel %vm3330_vm9, %v3753_v25, 0.0 }
 0x2bd   : > { %v3886_v52 = vsel %vm4240_vm1, %v1529_v39, %v1530_v63  ;;  %v1619_v15 = vsel %vm3728_vm15, %v3882_v33, 0.0  ;;  %1632 = vrot.lane.b32.xlu0 %v1623_v59, %s4229_s24  ;;  %v1722_v39 = vsel %vm3778_vm4, %v3882_v33, 0.0  ;;  %vm4241_vm8 = vmmov %vm4236_vm13  ;;  %1590 = vrot.lane.b32.xlu1 %v1582_v22, %s4229_s24 }
 0x2be   : > { %v1618_v17 = vsel %vm3778_vm4, %v3886_v52, 0.0  ;;  %v1721_v38 = vsel %vm3718_vm14, %v3886_v52, 0.0  ;;  %v1472_v63 = vsel %vm4241_vm8, %v1460_v32, %v1461_v47  ;;  %vm4242_vm13 = vmmov %vm4240_vm1  ;;  %vm4243_vm1 = vcmask 523264  }
 0x2bf   : > { %v1624_v9 = vpack.c.bf16 %v1619_v15, %v1618_v17  ;;  %v1727_v1 = vpack.c.bf16 %v1721_v38, %v1720_v51  ;;  %v1576_v8 = vsel %vm3280_vm5, %v1472_v63, 0.0  ;;  %v3917_v54 = vsel %vm4242_vm13, %v1531_v36, %v1532_v4  ;;  %vm4244_vm8 = vmmov %vm4242_vm13 }
 0x2c0   : > { %v1583_v55 = vpack.c.bf16 %v1577_v48, %v1576_v8  ;;  %v1541_v47 = vsel %vm4244_vm8, %v1532_v4, %v1525_v58  ;;  %v1620_v32 = vsel %vm3793_vm0, %v3917_v54, 0.0  ;;  %v1723_v29 = vsel %vm3728_vm15, %v3917_v54, 0.0 }
 0x2c1   : > { %1731 = vst.msk [vmem:[#allocation3 + $0x48] sm:$0xff] %vm4243_vm1, %v1727_v1  ;;  %v1621_v36 = vsel %vm3805_vm2, %v1541_v47, 0.0  ;;  %v1724_v51 = vsel %vm3793_vm0, %v1541_v47, 0.0  ;;  %v1728_v59 = vpack.c.bf16 %v1723_v29, %v1722_v39  ;;  %vm4245_vm13 = vcmp.lt.s32.totalorder %v3243_v44, 1  ;;  %1698 = vrot.lane.b32.xlu0 %v3875_v34, %s4229_s24  ;;  %1508 = vrot.lane.b32.xlu1 %v3724_v41, %s4229_s24 }
 0x2c2   : > { %v3936_v20 = vsel %vm4245_vm13, %v1463_v28, %v1464_v53  ;;  %v3940_v58 = vpack.c.bf16 %v1621_v36, %v1620_v32  ;;  %v1729_v4 = vpack.c.bf16 %v3070_v40, %v1724_v51  ;;  %vm4246_vm1 = vmmov %vm4245_vm13  ;;  %vm4247_vm8 = vcmask 523264  }
 0x2c3   : > { %v1470_v7 = vsel %vm4246_vm1, %v1462_v61, %v1463_v28  ;;  %v1579_v22 = vsel %vm3336_vm10, %v3936_v20, 0.0  ;;  %1732 = vst.msk [vmem:[#allocation3 + $0x70] sm:$0xff] %vm4247_vm8, %v1728_v59  ;;  %vm4248_vm13 = vmmov %vm4246_vm1  ;;  %v1468_v61 = vsel %vm4246_vm1, %v1464_v53, %v1465_v5  ;;  %v1662_v28 = vsel %vm3318_vm7, %v3839_v18, 0.0 }
 0x2c4   : > { %v1578_v17 = vsel %vm3330_vm9, %v1470_v7, 0.0  ;;  %v1467_v3 = vsel %vm4248_vm13, %v1465_v5, %v1466_v2  ;;  %vm4249_vm2 = vmmov %vm4247_vm8  ;;  %v1580_v15 = vsel %vm3353_vm12, %v1468_v61, 0.0  ;;  %vm4250_vm8 = vnez %v4210_v45 }
 0x2c5   : > { %1733 = vst.msk [vmem:[#allocation3 + $0x98] sm:$0xff] %vm4249_vm2, %v1729_v4  ;;  %v1584_v41 = vpack.c.bf16 %v1579_v22, %v1578_v17  ;;  %v1581_v38 = vsel %vm3342_vm11, %v1467_v3, 0.0  ;;  %v1663_v2 = vsel %vm4250_vm8, %v1472_v63, 0.0  ;;  %v1664_v44 = vsel %vm3280_vm5, %v3753_v25, 0.0  ;;  %1634 = vrot.lane.b32.xlu0 %v1624_v9, %s4229_s24  ;;  %1592 = vrot.lane.b32.xlu1 %v1583_v55, %s4229_s24  ;;  %vm4252_vm13 = vmmov %vm4249_vm2 }
 0x2c6   : > { %v1585_v39 = vpack.c.bf16 %v1581_v38, %v1580_v15  ;;  %v1670_v1 = vpack.c.bf16 %v1663_v2, %v1662_v28  ;;  %v1665_v43 = vsel %vm3286_vm6, %v1470_v7, 0.0  ;;  %vm4251_vm7 = vnez %v4220_v30  ;;  %vm4253_vm1 = vmmov %vm4249_vm2 }
 0x2c7   : > { %v1671_v5 = vpack.c.bf16 %v1665_v43, %v1664_v44  ;;  %v1559_v53 = vsel %vm4251_vm7, %v3771_v16, 0.0  ;;  %v1666_v8 = vsel %vm3330_vm9, %v3936_v20, 0.0  ;;  %v1667_v48 = vsel %vm3336_vm10, %v1468_v61, 0.0  ;;  %vm4255_vm7 = vmmov %vm4253_vm1  ;;  %v1738_v44 = vld [vmem:[#allocation3 + $0x20] sm:$0xff] }
 0x2c8   : > { %1674 = vst.msk [vmem:[#allocation3 + $0x18] sm:$0xff] %vm4249_vm2, %v1670_v1  ;;  %v1566_v47 = vpack.c.bf16 %v1559_v53, %v3070_v40  ;;  %v1672_v32 = vpack.c.bf16 %v1667_v48, %v1666_v8  ;;  %v1476_v9 = vsel %vm4250_vm8, %v3871_v31, 0.0  ;;  %v1608_v30 = vpack.c.bf16 %v3824_v42, %v3798_v13  ;;  %vm4254_vm8 = vmmov %vm4253_vm1  ;;  %v1743_v53 = vld [vmem:[#allocation3 + $0x48] sm:$0xff] }
 0x2c9   : > { %1675 = vst.msk [vmem:[#allocation3 + $0x40] sm:$0xff] %vm4252_vm13, %v1671_v5  ;;  %v1483_v16 = vpack.c.bf16 %v1476_v9, %v3070_v40  ;;  %v1560_v55 = vsel %vm3675_vm3, %v3765_v14, 0.0  ;;  %v1561_v29 = vsel %vm3718_vm14, %v3745_v27, 0.0  ;;  %v1668_v36 = vsel %vm3353_vm12, %v1467_v3, 0.0  ;;  %1700 = vrot.lane.b32.xlu0 %v1689_v10, %s4229_s24  ;;  %vm4256_vm3 = vmmov %vm4253_vm1  ;;  %1510 = vrot.lane.b32.xlu1 %v3714_v6, %s4229_s24  ;;  %v3000_v9 = vld [vmem:[%s4187_s9 + $0x8] sm:$0xff]  }
 0x2ca   : > { %1570 = vst.msk [vmem:[#allocation3 + $0x8] sm:$0xff] %vm4253_vm1, %v1566_v47  ;;  %v1567_v45 = vpack.c.bf16 %v1561_v29, %v1560_v55  ;;  %v1673_v13 = vpack.c.bf16 %v3070_v40, %v1668_v36  ;;  %v1478_v35 = vsel %vm3286_vm6, %v1472_v63, 0.0  ;;  %v1609_v14 = vpack.c.bf16 %v3817_v37, %v3783_v24  ;;  %vm4257_vm5 = vmmov %vm4253_vm1  ;;  %v2997_v63 = vld [vmem:[%s4185_s7 + $0x110] sm:$0xff]  }
 0x2cb   : > { %1676 = vst.msk [vmem:[#allocation3 + $0x68] sm:$0xff] %vm4254_vm8, %v1672_v32  ;;  %v1484_v27 = vpack.c.bf16 %v1478_v35, %v1477_v23  ;;  %v1562_v42 = vsel %vm3778_vm4, %v3849_v21, 0.0  ;;  %v1563_v12 = vsel %vm3728_vm15, %v3886_v52, 0.0  ;;  %vm4258_vm6 = vmmov %vm4253_vm1  ;;  %v1564_v40 = vsel %vm3793_vm0, %v3882_v33, 0.0  ;;  %v1748_v8 = vld [vmem:[#allocation3 + $0x70] sm:$0xff]  ;;  %v2999_v32 = vld [vmem:[%s4187_s9] sm:$0xff]  }
 0x2cc   : > { %1612 = vst.msk [vmem:[#allocation3 + $0x60] sm:$0xff] %vm4255_vm7, %v1608_v30  ;;  %v1568_v11 = vpack.c.bf16 %v1563_v12, %v1562_v42  ;;  %vm4259_vm14 = vnez %v4235_v62  ;;  %vm4260_vm4 = vmmov %vm4253_vm1  ;;  %v1480_v24 = vsel %vm3336_vm10, %v1470_v7, 0.0  ;;  %v1481_v0 = vsel %vm3353_vm12, %v3936_v20, 0.0  ;;  %v1753_v47 = vld [vmem:[#allocation3 + $0x98] sm:$0xff]  ;;  %2842 = vmatprep.subr.bf16.mxu1 %v2999_v32  ;;  %v3001_v30 = vld [vmem:[%s4187_s9 + $0x10] sm:$0xff]  }
 0x2cd   : > { %1488 = vst.msk [vmem:[#allocation3] sm:$0xff] %vm4256_vm3, %v1483_v16  ;;  %v1565_v19 = vsel %vm4259_vm14, %v3917_v54, 0.0  ;;  %vm4261_vm15 = vmmov %vm4253_vm1  ;;  %v1482_v62 = vsel %vm3342_vm11, %v1468_v61, 0.0  ;;  %v1485_v37 = vpack.c.bf16 %v1480_v24, %v1479_v56  ;;  %1636 = vrot.lane.b32.xlu0 %v3940_v58, %s4229_s24  ;;  %1594 = vrot.lane.b32.xlu1 %v1584_v41, %s4229_s24  ;;  %vm1520_vm11 = vcmask 1048064   ;;  %v3002_v16 = vld [vmem:[%s4187_s9 + $0x18] sm:$0xff]  }
 0x2ce   : > { %1571 = vst.msk [vmem:[#allocation3 + $0x30] sm:$0xff] %vm4257_vm5, %v1567_v45  ;;  %v1569_v6 = vpack.c.bf16 %v1565_v19, %v1564_v40  ;;  %vm4262_vm0 = vmmov %vm4253_vm1  ;;  %v1486_v46 = vpack.c.bf16 %v1482_v62, %v1481_v0  ;;  %v4103_v19 = vld [vmem:[%s4186_s8] ss:$0 sm:$0xff]  ;;  %vm2385_vm14 = vcmask 80896  }
 0x2cf   : > { %1677 = vst.msk [vmem:[#allocation3 + $0x90] sm:$0xff] %vm4258_vm6, %v1673_v13  ;;  %vm4263_vm9 = vmmov %vm4262_vm0 }
 0x2d0   : > { %1489 = vst.msk [vmem:[#allocation3 + $0x28] sm:$0xff] %vm4260_vm4, %v1484_v27  ;;  %vm4264_vm2 = vmmov %vm4262_vm0  ;;  %vm2410_vm4 = vcmask 73728  }
 0x2d1   : > { %1613 = vst.msk [vmem:[#allocation3 + $0x88] sm:$0xff] %vm4261_vm15, %v1609_v14  ;;  %vm4265_vm10 = vmmov %vm4262_vm0  ;;  %1596 = vrot.lane.b32.xlu0 %v1585_v39, %s4229_s24  ;;  %1512 = vrot.lane.b32.xlu1 %v3829_v60, %s4229_s24  ;;  %v2996_v60 = vld [vmem:[%s4185_s7 + $0x108] sm:$0xff]  }
 0x2d2   : > { %1572 = vst.msk [vmem:[#allocation3 + $0x58] sm:$0xff] %vm4262_vm0, %v1568_v11  ;;  %vm4266_vm12 = vmmov %vm4262_vm0 }
 0x2d3   : > { %1573 = vst.msk [vmem:[#allocation3 + $0x80] sm:$0xff] %vm4263_vm9, %v1569_v6  ;;  %vm4267_vm13 = vmmov %vm4262_vm0 }
 0x2d4   : > { %1490 = vst.msk [vmem:[#allocation3 + $0x50] sm:$0xff] %vm4264_vm2, %v1485_v37  ;;  %vm4268_vm1 = vmmov %vm4262_vm0 }
 0x2d5   : > { %1491 = vst.msk [vmem:[#allocation3 + $0x78] sm:$0xff] %vm4265_vm10, %v1486_v46  ;;  %1514 = vrot.lane.b32.xlu1 %v3875_v34, %s4229_s24  ;;  %vm4269_vm8 = vmmov %vm4262_vm0  ;;  %s378_s24 = scalar_lea.vmem [#allocation4], %s377_s13 }
 0x2d6   : > { %vm4270_vm7 = vmmov %vm4262_vm0  ;;  %s2425_s29 = sshll.u32 %s378_s24, 4  ;;  %s4138_s29 = int_to_ptr.vmem [resolvable:$true] %s2425_s29 }
 0x2d7   : > { %vm4271_vm3 = vmmov %vm4262_vm0  ;;  %s3003_s14 = scalar_lea.vmem %s4138_s29, 16  ;;  %p3010_p0 = scmp.lt.s32.totalorder %s4138_s29, %s3008_s12 }
 0x2d8   : > { %vm4272_vm5 = vmmov %vm4262_vm0  ;;  %p3004_p11 = scmp.ne.s32.totalorder %s4138_s29, %s3003_s14  ;;  %p3011_p1 = scmp.lt.s32.totalorder %s3009_s0, %s3003_s14 }
 0x2d9   : > { %vm4273_vm6 = vmmov %vm4262_vm0 }
 0x2da   : > { %p3005_p12 = pnand %p3004_p11, %p3171_p5  ;;  %p3012_p2 = por %p3011_p1, %p3010_p0 }
 0x2dc   : > { %p3006_p13 = pneg %p3005_p12 }
 0x2de   : > { %p3013_p3 = pnand %p3012_p2, %p3006_p13 }
 0x323   : > { %v1695_v49 = vpop.permute.xlu0 %1694 }
 0x324   : > { %1706 = vst.msk [vmem:[#allocation3 + $0x18] sm:$0xff] %vm1520_vm11, %v1695_v49 }
 0x327   : > { %v1631_v50 = vpop.permute.xlu1 %1630 }
 0x328   : > { %1642 = vst.msk [vmem:[#allocation3 + $0x10] sm:$0xff] %vm1520_vm11, %v1631_v50 }
 0x32a   : > { %v1697_v57 = vpop.permute.xlu0 %1696 }
 0x32b   : > { %1707 = vst.msk [vmem:[#allocation3 + $0x40] sm:$0xff] %vm1520_vm11, %v1697_v57  ;;  %v1737_v25 = vld [vmem:[#allocation3 + $0x18] sm:$0xff] }
 0x32c   : > { %2158 = vmatprep.mubr.bf16.mxu0 %v1737_v25 }
 0x32f   : > { %v1633_v18 = vpop.permute.xlu0 %1632  ;;  %v1591_v21 = vpop.permute.xlu1 %1590  ;;  %v1736_v31 = vld [vmem:[#allocation3 + $0x10] sm:$0xff] }
 0x330   : > { %1643 = vst.msk [vmem:[#allocation3 + $0x38] sm:$0xff] %vm1520_vm11, %v1633_v18  ;;  %1602 = vst.msk [vmem:[#allocation3 + $0x8] sm:$0xff] %vm1520_vm11, %v1591_v21  ;;  %2159 = vmatmul.mubr.bf16.vlgmr.msra.gmra.mrb[40].mxu0 %v1736_v31 }
 0x331   : > { %2827 = vmatpush3.bf16.msra.mxu0 %v3759_v26  ;;  %v2998_v26 = vld [vmem:[%s4185_s7 + $0x118] sm:$0xff]  }
 0x332   : > { %v1742_v33 = vld [vmem:[#allocation3 + $0x40] sm:$0xff]  ;;  %2828 = vmatprep.subr.bf16.mxu0 %v2996_v60 }
 0x333   : > { %v1699_v34 = vpop.permute.xlu0 %1698  ;;  %2166 = vmatprep.mubr.bf16.mxu0 %v1742_v33  ;;  %v1509_v52 = vpop.permute.xlu1 %1508 }
 0x334   : > { %1708 = vst.msk [vmem:[#allocation3 + $0x68] sm:$0xff] %vm1520_vm11, %v1699_v34  ;;  %1521 = vst.msk [vmem:[#allocation3] sm:$0xff] %vm1520_vm11, %v1509_v52 }
 0x335   : > { %2829 = vmatpush3.bf16.msra.mxu0 %v2996_v60 }
 0x336   : > { %2830 = vmatprep.subr.bf16.mxu0 %v2997_v63 }
 0x337   : > { %v1635_v10 = vpop.permute.xlu0 %1634  ;;  %v1593_v54 = vpop.permute.xlu1 %1592  ;;  %v1735_v51 = vld [vmem:[#allocation3 + $0x8] sm:$0xff]  ;;  %v1741_v59 = vld [vmem:[#allocation3 + $0x38] sm:$0xff] }
 0x338   : > { %1644 = vst.msk [vmem:[#allocation3 + $0x60] sm:$0xff] %vm1520_vm11, %v1635_v10  ;;  %1603 = vst.msk [vmem:[#allocation3 + $0x30] sm:$0xff] %vm1520_vm11, %v1593_v54  ;;  %2093 = vmatprep.mubr.bf16.mxu1 %v1735_v51  ;;  %2167 = vmatmul.mubr.bf16.gmra.mrb[44].mxu0 %v1741_v59 }
 0x339   : > { %2831 = vmatpush3.bf16.msra.mxu0 %v2997_v63 }
 0x33a   : > { %2832 = vmatprep.subr.bf16.mxu0 %v2998_v26 }
 0x33b   : > { %v1701_v20 = vpop.permute.xlu0 %1700  ;;  %v1747_v58 = vld [vmem:[#allocation3 + $0x68] sm:$0xff]  ;;  %v1511_v4 = vpop.permute.xlu1 %1510  ;;  %v1734_v7 = vld [vmem:[#allocation3] sm:$0xff] }
 0x33c   : > { %1709 = vst.msk [vmem:[#allocation3 + $0x90] sm:$0xff] %vm1520_vm11, %v1701_v20  ;;  %2174 = vmatprep.mubr.bf16.mxu0 %v1747_v58  ;;  %1522 = vst.msk [vmem:[#allocation3 + $0x28] sm:$0xff] %vm1520_vm11, %v1511_v4  ;;  %2094 = vmatmul.mubr.bf16.vlgmr.msra.gmra.mrb[24].mxu1 %v1734_v7 }
 0x33d   : > { %2833 = vmatpush3.bf16.msra.mxu0 %v2998_v26  ;;  %2843 = vmatpush3.bf16.msra.mxu1 %v2999_v32 }
 0x33e   : > { %2844 = vmatprep.subr.bf16.mxu1 %v3000_v9 }
 0x33f   : > { %v1637_v22 = vpop.permute.xlu0 %1636  ;;  %v1595_v17 = vpop.permute.xlu1 %1594  ;;  %v1740_v3 = vld [vmem:[#allocation3 + $0x30] sm:$0xff]  ;;  %v1746_v61 = vld [vmem:[#allocation3 + $0x60] sm:$0xff] }
 0x340   : > { %1645 = vst.msk [vmem:[#allocation3 + $0x88] sm:$0xff] %vm1520_vm11, %v1637_v22  ;;  %1604 = vst.msk [vmem:[#allocation3 + $0x58] sm:$0xff] %vm1520_vm11, %v1595_v17  ;;  %2101 = vmatprep.mubr.bf16.mxu1 %v1740_v3  ;;  %2175 = vmatmul.mubr.bf16.gmra.mrb[48].mxu0 %v1746_v61 }
 0x341   : > { %2845 = vmatpush3.bf16.msra.mxu1 %v3000_v9 }
 0x342   : > { %2846 = vmatprep.subr.bf16.mxu1 %v3001_v30 }
 0x343   : > { %v1597_v28 = vpop.permute.xlu0 %1596  ;;  %v1752_v41 = vld [vmem:[#allocation3 + $0x90] sm:$0xff]  ;;  %v1513_v15 = vpop.permute.xlu1 %1512  ;;  %v1739_v38 = vld [vmem:[#allocation3 + $0x28] sm:$0xff] }
 0x344   : > { %1605 = vst.msk [vmem:[#allocation3 + $0x80] sm:$0xff] %vm1520_vm11, %v1597_v28  ;;  %2182 = vmatprep.mubr.bf16.mxu0 %v1752_v41  ;;  %1523 = vst.msk [vmem:[#allocation3 + $0x50] sm:$0xff] %vm1520_vm11, %v1513_v15  ;;  %2102 = vmatmul.mubr.bf16.gmra.mrb[28].mxu1 %v1739_v38  ;;  %v2543_v38 = vld [vmem:[%s4184_s6] ss:$0 sm:$0xff] }
 0x345   : > { %2847 = vmatpush3.bf16.msra.mxu1 %v3001_v30 }
 0x346   : > { %2848 = vmatprep.subr.bf16.mxu1 %v3002_v16 }
 0x347   : > { %v1515_v2 = vpop.permute.xlu1 %1514  ;;  %v1745_v39 = vld [vmem:[#allocation3 + $0x58] sm:$0xff]  ;;  %v1751_v1 = vld [vmem:[#allocation3 + $0x88] sm:$0xff] }
 0x348   : > { %1524 = vst.msk [vmem:[#allocation3 + $0x78] sm:$0xff] %vm1520_vm11, %v1515_v2  ;;  %2109 = vmatprep.mubr.bf16.mxu1 %v1745_v39  ;;  %2183 = vmatmul.mubr.bf16.gmra.mrb[52].mxu0 %v1751_v1 }
 0x349   : > { %2834 = vmatprep.mubr.msk.bf16.mxu0 %vm4266_vm12, %v1738_v44  ;;  %2849 = vmatpush3.bf16.msra.mxu1 %v3002_v16 }
 0x34b   : > { %v1744_v43 = vld [vmem:[#allocation3 + $0x50] sm:$0xff]  ;;  %v1750_v5 = vld [vmem:[#allocation3 + $0x80] sm:$0xff] }
 0x34c   : > { %2110 = vmatmul.mubr.bf16.gmra.mrb[32].mxu1 %v1744_v43 }
 0x34d   : > { %2117 = vmatprep.mubr.bf16.mxu1 %v1750_v5 }
 0x34f   : > { %v1749_v48 = vld [vmem:[#allocation3 + $0x78] sm:$0xff] }
 0x350   : > { %2835 = vmatmul.mubr.msk.bf16.vlgmr.msra.gmra.mrb[32].mxu0 %vm4267_vm13, %v1743_v53 }
 0x351   : > { %2838 = vmatprep.mubr.msk.bf16.mxu0 %vm4268_vm1, %v1748_v8 }
 0x354   : > { %2118 = vmatmul.mubr.bf16.gmra.mrb[36].mxu1 %v1749_v48 }
 0x358   : > { %2839 = vmatmul.mubr.msk.bf16.gmra.mrb[36].mxu0 %vm4269_vm8, %v1753_v47 }
 0x403   : > { %v2728_v55 = vpop.f32.mrb[40].mxu0 }
 0x404   : > { %v2729_v29 = vpop.f32.mrb[41].mxu0 }
 0x405   : > { %v2730_v36 = vadd.f32 %v2729_v29, %v2728_v55  ;;  %v2731_v45 = vpop.f32.mrb[42].mxu0 }
 0x406   : > { %v2732_v13 = vpop.f32.mrb[43].mxu0 }
 0x407   : > { %v2733_v35 = vadd.f32 %v2732_v13, %v2731_v45 }
 0x40b   : > { %v2734_v23 = vpop.f32.mrb[44].mxu0 }
 0x40c   : > { %v2735_v27 = vpop.f32.mrb[45].mxu0 }
 0x40d   : > { %v2736_v14 = vadd.f32 %v2735_v27, %v2734_v23  ;;  %v2737_v42 = vpop.f32.mrb[46].mxu0 }
 0x40e   : > { %v2738_v11 = vpop.f32.mrb[47].mxu0 }
 0x40f   : > { %v2688_v12 = vpop.f32.mrb[24].mxu1  ;;  %v2739_v40 = vadd.f32 %v2738_v11, %v2737_v42 }
 0x410   : > { %v2689_v56 = vpop.f32.mrb[25].mxu1 }
 0x411   : > { %v2690_v6 = vadd.f32 %v2689_v56, %v2688_v12  ;;  %v2691_v24 = vpop.f32.mrb[26].mxu1 }
 0x412   : > { %v2692_v0 = vpop.f32.mrb[27].mxu1 }
 0x413   : > { %v2096_v62 = vadd.f32 %v2690_v6, %v4103_v19  ;;  %v2693_v37 = vadd.f32 %v2692_v0, %v2691_v24  ;;  %v2740_v46 = vpop.f32.mrb[48].mxu0 }
 0x414   : > { %v2741_v50 = vpop.f32.mrb[49].mxu0 }
 0x415   : > { %v2099_v49 = vadd.f32 %v2693_v37, %v4103_v19  ;;  %v2161_v57 = vadd.f32 %v2730_v36, %v2096_v62  ;;  %v2742_v25 = vadd.f32 %v2741_v50, %v2740_v46  ;;  %v2743_v18 = vpop.f32.mrb[50].mxu0 }
 0x416   : > { %v2744_v60 = vpop.f32.mrb[51].mxu0 }
 0x417   : > { %v2694_v21 = vpop.f32.mrb[28].mxu1  ;;  %v2164_v31 = vadd.f32 %v2733_v35, %v2099_v49  ;;  %v2745_v34 = vadd.f32 %v2744_v60, %v2743_v18  ;;  %v2860_v5 = vadd.f32 %v2543_v38, %v2161_v57 }
 0x418   : > { %v2695_v33 = vpop.f32.mrb[29].mxu1 }
 0x419   : > { %v2696_v52 = vadd.f32 %v2695_v33, %v2694_v21  ;;  %v2697_v63 = vpop.f32.mrb[30].mxu1  ;;  %v2864_v16 = vadd.f32 %v2543_v38, %v2164_v31 }
 0x41a   : > { %v2698_v10 = vpop.f32.mrb[31].mxu1 }
 0x41b   : > { %v2104_v54 = vadd.f32 %v2696_v52, %v4103_v19  ;;  %v2699_v51 = vadd.f32 %v2698_v10, %v2697_v63  ;;  %v2746_v26 = vpop.f32.mrb[52].mxu0 }
 0x41c   : > { %v2747_v20 = vpop.f32.mrb[53].mxu0 }
 0x41d   : > { %v2107_v59 = vadd.f32 %v2699_v51, %v4103_v19  ;;  %v2169_v58 = vadd.f32 %v2736_v14, %v2104_v54  ;;  %v2748_v4 = vadd.f32 %v2747_v20, %v2746_v26  ;;  %v2749_v7 = vpop.f32.mrb[54].mxu0 }
 0x41e   : > { %v2750_v17 = vpop.f32.mrb[55].mxu0 }
 0x41f   : > { %v2700_v22 = vpop.f32.mrb[32].mxu1  ;;  %v2172_v3 = vadd.f32 %v2739_v40, %v2107_v59  ;;  %v2751_v61 = vadd.f32 %v2750_v17, %v2749_v7  ;;  %v2858_v44 = vadd.f32 %v2543_v38, %v2169_v58 }
 0x420   : > { %v2701_v28 = vpop.f32.mrb[33].mxu1 }
 0x421   : > { %v2702_v41 = vadd.f32 %v2701_v28, %v2700_v22  ;;  %v2703_v15 = vpop.f32.mrb[34].mxu1  ;;  %v2862_v47 = vadd.f32 %v2543_v38, %v2172_v3 }
 0x422   : > { %v2704_v2 = vpop.f32.mrb[35].mxu1 }
 0x423   : > { %v2112_v39 = vadd.f32 %v2702_v41, %v4103_v19  ;;  %v2705_v1 = vadd.f32 %v2704_v2, %v2703_v15  ;;  %v2836_v43 = vpop.f32.mrb[32].mxu0 }
 0x424   : > { %v2859_v8 = vadd.f32 %v2858_v44, %v2836_v43  ;;  %v2225_v48 = vpop.f32.mrb[33].mxu0 }
 0x425   : > { %v2115_v53 = vadd.f32 %v2705_v1, %v4103_v19  ;;  %v2177_v32 = vadd.f32 %v2742_v25, %v2112_v39  ;;  %v2861_v9 = vadd.f32 %v2860_v5, %v2225_v48  ;;  %v2837_v30 = vpop.f32.mrb[34].mxu0 }
 0x426   : > { %v2863_v55 = vadd.f32 %v2862_v47, %v2837_v30  ;;  %v2228_v36 = vpop.f32.mrb[35].mxu0  ;;  %v2266_v23 = vmax.f32 %v2859_v8, 0.0 }
 0x427   : > { %v2706_v29 = vpop.f32.mrb[36].mxu1  ;;  %v2180_v45 = vadd.f32 %v2745_v34, %v2115_v53  ;;  %v2865_v13 = vadd.f32 %v2864_v16, %v2228_v36  ;;  %v2264_v12 = vmax.f32 %v2861_v9, 0.0  ;;  %v2868_v37 = vadd.f32 %v2543_v38, %v2177_v32 }
 0x428   : > { %v2707_v35 = vpop.f32.mrb[37].mxu1  ;;  %v2267_v27 = vmax.f32 %v2863_v55, 0.0 }
 0x429   : > { %v2708_v14 = vadd.f32 %v2707_v35, %v2706_v29  ;;  %v2709_v42 = vpop.f32.mrb[38].mxu1  ;;  %v2265_v11 = vmax.f32 %v2865_v13, 0.0  ;;  %v2872_v18 = vadd.f32 %v2543_v38, %v2180_v45  ;;  %v2408_v45 = vld [vmem:[%s4188_s10] sm:$0x1] }
 0x42a   : > { %v2710_v40 = vpop.f32.mrb[39].mxu1  ;;  %v2273_v56 = vpack.c.bf16 %v2267_v27, %v2266_v23 }
 0x42b   : > { %v2120_v6 = vadd.f32 %v2708_v14, %v4103_v19  ;;  %v2711_v24 = vadd.f32 %v2710_v40, %v2709_v42  ;;  %v2272_v0 = vpack.c.bf16 %v2265_v11, %v2264_v12  ;;  %v2840_v62 = vpop.f32.mrb[36].mxu0 }
 0x42c   : > { %v2241_v50 = vpop.f32.mrb[37].mxu0 }
 0x42d   : > { %v2123_v46 = vadd.f32 %v2711_v24, %v4103_v19  ;;  %v2185_v49 = vadd.f32 %v2748_v4, %v2120_v6  ;;  %v2869_v57 = vadd.f32 %v2868_v37, %v2241_v50  ;;  %v2841_v25 = vpop.f32.mrb[38].mxu0  ;;  %2850 = vmatprep.mubr.msk.bf16.mxu1 %vm4270_vm7, %v2272_v0 }
 0x42e   : > { %v2244_v31 = vpop.f32.mrb[39].mxu0  ;;  %2851 = vmatmul.mubr.msk.bf16.vlgmr.msra.gmra.mrb[40].mxu1 %vm4271_vm3, %v2273_v56 }
 0x42f   : > { %v2866_v21 = vadd.f32 %v2543_v38, %v2185_v49  ;;  %v2188_v60 = vadd.f32 %v2751_v61, %v2123_v46  ;;  %v2873_v34 = vadd.f32 %v2872_v18, %v2244_v31  ;;  %v2268_v63 = vmax.f32 %v2869_v57, 0.0 }
 0x431   : > { %v2867_v33 = vadd.f32 %v2866_v21, %v2840_v62  ;;  %v2870_v52 = vadd.f32 %v2543_v38, %v2188_v60  ;;  %v2269_v10 = vmax.f32 %v2873_v34, 0.0 }
 0x433   : > { %v2871_v54 = vadd.f32 %v2870_v52, %v2841_v25  ;;  %v2274_v51 = vpack.c.bf16 %v2269_v10, %v2268_v63  ;;  %v2270_v19 = vmax.f32 %v2867_v33, 0.0 }
 0x435   : > { %v2271_v26 = vmax.f32 %v2871_v54, 0.0  ;;  %2854 = vmatprep.mubr.msk.bf16.mxu1 %vm4272_vm5, %v2274_v51 }
 0x437   : > { %v2275_v59 = vpack.c.bf16 %v2271_v26, %v2270_v19 }
 0x439   : > { %2855 = vmatmul.mubr.msk.bf16.gmra.mrb[44].mxu1 %vm4273_vm6, %v2275_v59 }
 0x501   : > { %v2852_v20 = vpop.f32.mrb[40].mxu1 }
 0x502   : > { %v2354_v58 = vpop.f32.mrb[41].mxu1  ;;  %v2389_v61 = vsel %vm2385_vm14, %v2852_v20, 0.0 }
 0x503   : > { %v2853_v4 = vpop.f32.mrb[42].mxu1  ;;  %v2386_v22 = vsel %vm2385_vm14, %v2354_v58, 0.0 }
 0x504   : > { %v2357_v7 = vpop.f32.mrb[43].mxu1  ;;  %v2391_v41 = vsel %vm2385_vm14, %v2853_v4, 0.0 }
 0x505   : > { %v2387_v17 = vsel %vm2385_vm14, %v2357_v7, 0.0 }
 0x506   : > { %v2388_v3 = vadd.f32 %v2387_v17, %v2386_v22 }
 0x508   : > { %v2390_v28 = vadd.f32 %v2389_v61, %v2388_v3 }
 0x50a   : > { %v2392_v15 = vadd.f32 %v2391_v41, %v2390_v28 }
 0x50c   : > { %v2856_v38 = vpop.f32.mrb[44].mxu1 }
 0x50d   : > { %v2370_v2 = vpop.f32.mrb[45].mxu1  ;;  %v2397_v8 = vsel %vm2385_vm14, %v2856_v38, 0.0 }
 0x50e   : > { %v2393_v39 = vsel %vm2385_vm14, %v2370_v2, 0.0  ;;  %v2857_v1 = vpop.f32.mrb[46].mxu1 }
 0x50f   : > { %v2394_v44 = vadd.f32 %v2393_v39, %v2392_v15  ;;  %v2373_v43 = vpop.f32.mrb[47].mxu1  ;;  %v2399_v47 = vsel %vm2385_vm14, %v2857_v1, 0.0 }
 0x510   : > { %v2395_v5 = vsel %vm2385_vm14, %v2373_v43, 0.0 }
 0x511   : > { %v2396_v53 = vadd.f32 %v2395_v5, %v2394_v44 }
 0x513   : > { %v2398_v48 = vadd.f32 %v2397_v8, %v2396_v53 }
 0x515   : > { %v2400_v32 = vadd.f32 %v2399_v47, %v2398_v48 }
 0x517   : > { %v2401_v9 = vrot.slane %v2400_v32, 4 }
 0x519   : > { %v2402_v30 = vadd.f32 %v2401_v9, %v2400_v32 }
 0x51b   : > { %v2403_v16 = vrot.slane %v2402_v30, 2 }
 0x51d   : > { %v2404_v55 = vadd.f32 %v2403_v16, %v2402_v30 }
 0x51f   : > { %v2405_v29 = vrot.slane %v2404_v55, 1 }
 0x521   : > { %v2406_v36 = vadd.f32 %v2405_v29, %v2404_v55 }
 0x523   : > { %v2407_v13 = vmul.f32 0.015625, %v2406_v36 }
 0x525   : > { %v2409_v35 = vadd.f32 %v2408_v45, %v2407_v13 }
 0x527   : > { %2411 = vst.msk [vmem:[%s378_s24] sm:$0x1] %vm2410_vm4, %v2409_v35 }
 0x528   : > { %3016 = shalt.err (!%p3013_p3)
}
 0x529   : > { %s3017_s13 = scalar_lea.hbm %s4136_s16, 16  ;;  %s3021_s30 = scalar_lea.hbm %s4189_s11, 32 }
 0x52a   : > { %p3018_p4 = scmp.ne.s32.totalorder %s4136_s16, %s3017_s13  ;;  %p3022_p9 = scmp.lt.u32.totalorder %s4136_s16, %s4189_s11 }
 0x52b   : > { %p3023_p10 = scmp.lt.u32.totalorder %s3021_s30, %s3017_s13  ;;  %p3025_p12 = scmp.lt.u32.totalorder %s3017_s13, %s4136_s16 }
 0x52c   : > { %p3019_p7 = pnand %p3018_p4, %p3171_p5 }
 0x52d   : > { %p3024_p11 = por %p3023_p10, %p3022_p9 }
 0x52e   : > { %p3020_p8 = pneg %p3019_p7 }
 0x52f   : > { %p3026_p13 = por %p3025_p12, %p3024_p11 }
 0x531   : > { %p3027_p0 = pnand %p3026_p13, %p3020_p8 }
 0x533   : > { %3030 = shalt.err (!%p3027_p0)
}
 0x534   : > { %2882 = dma.vmem_to_hbm [thread:$0]  (%p3171_p5), %s4138_s29, 16, %s4136_s16, %s2413_s22  }
 0x535 PF: > { %p2888_p1 = scmp.ge.s32.totalorder %s3065_s20, 2  ;;  %s2437_s0 = sand.u32 1, %s3053_s17  }
 0x536   : > { %s2438_s14 = scalar_lea.sflag [#allocation5], %s2437_s0 }
 0x537   : > { %p2885_p2 = pnand %p2888_p1, %p3175_p6 }
 0x539   : > { %3048 = dma.done.wait (!%p2885_p2), %s2438_s14, 16  }
 0x53a   : > { %3050 = vsyncadd (!%p2885_p2), %s2438_s14, 4294967280  ;;  %p21_p3 = scmp.ge.s32.totalorder %s3158_s23, 4   ;;  %s4274_s17 = smov %s3057_s18 }
 0x53b   : > { %s4275_s18 = smov %s3061_s19  ;;  %s4276_s19 = smov %s3169_s26 }
 0x53c   : > { %s4277_s20 = smov %s3158_s23  ;;  %23 = sbr.rel (!%p21_p3) target bundleno = 5 (0x5), region = 99 }
 0x543   :  { %2442 = vsyncpa [#allocation5], 1 }
 0x544   :  { %2444 = vsyncpa [#allocation5 + $0x1], 1 }

</bundles_post_ra>
